<compile_context>
chip_gen: v7x
topology: tpu7x:2x2x1
jax: 0.10.0
libtpu: 0.0.40
codegen_flags: <defaults>
</compile_context>

<pallas_src>
import math

import jax
import jax.numpy as jnp
from jax.experimental import pallas as pl
from jax.experimental.pallas import tpu as pltpu


_INV_SQRT2 = 1.0 / math.sqrt(2.0)


def _gelu_exact(x):
    # nn.GELU() default: 0.5 * x * (1 + erf(x / sqrt(2))) -- used only by the reference.
    return 0.5 * x * (1.0 + jax.lax.erf(x * _INV_SQRT2))


def _round_up(n, m):
    return ((n + m - 1) // m) * m


def _default_act_dtype():
    # bf16 activation math on v6e/v7x (bf16 VALU/EUP); keep f32 on v5e.
    try:
        kind = jax.devices()[0].device_kind.lower()
    except Exception:
        return jnp.bfloat16
    return jnp.float32 if "v5" in kind else jnp.bfloat16


def make_actor_critic_cnn(window_size, n_features, action_dim,
                          n_filters=(64, 128), kernel_sizes=(3, 2),
                          block_batch=256, act_dtype=None):
    """Builds the Pallas forward function. Returns a jitted forward(x, params)."""
    K1, K2 = kernel_sizes
    C1, C2 = n_filters
    T1 = window_size - K1 + 1          # conv1 output length
    T2 = T1 - K2 + 1                   # conv2 output length
    KF = K1 * n_features               # im2col'd conv1 contraction dim
    NPAIR = T2 // 2                    # paired FC1 time taps (K = 2*C2)
    HAS_REM = (T2 % 2) == 1            # odd remainder tap for FC1
    OUT_W = 128                        # packed, lane-dense output width
    VALUE_LANE = 64                    # critic value lane inside the packed output
    assert action_dim <= 64, "packed output layout assumes action_dim <= 64"
    assert block_batch % 16 == 0 and block_batch >= 16
    if act_dtype is None:
        act_dtype = _default_act_dtype()

    def _gelu(x):
        # tanh-approx GELU -> tanh runs on the EUP slot; bf16 on v6e/v7x halves vreg traffic.
        return jax.nn.gelu(x.astype(act_dtype), approximate=True)

    def _make_kernel(TB):
        def kernel(xc_ref,
                   w1_ref, b1_ref, w2_ref, b2_ref,
                   wf1p_ref, wf1r_ref, bf1_ref,
                   wf2_ref, bf2_ref, wf3_ref, bf3_ref, wf4_ref, bf4_ref,
                   out_ref):
            # xc: time-major block, rows ordered (t, b) -> row index t*TB + b
            xc = xc_ref[0]                                              # (T1*TB, KF) bf16

            # ---- Conv1d #1 (+ GELU): single im2col matmul -------------------
            h = jnp.dot(xc, w1_ref[...], preferred_element_type=jnp.float32)
            h = _gelu(h + b1_ref[...]).astype(jnp.bfloat16)             # (T1*TB, C1)

            # ---- Conv1d #2 (+ GELU): lane-concat taps -> ONE K=K2*C1 matmul --
            taps = [h[dk * TB: dk * TB + T2 * TB, :] for dk in range(K2)]
            h_cat = taps[0] if K2 == 1 else jnp.concatenate(taps, axis=-1)
            h2 = jnp.dot(h_cat, w2_ref[...], preferred_element_type=jnp.float32)
            h2 = _gelu(h2 + b2_ref[...]).astype(jnp.bfloat16)           # (T2*TB, C2)

            # ---- Fused (actor||critic) first FC: paired taps, K=2*C2 --------
            z = None
            for c in range(NPAIR):
                lo, mid, hi = 2 * c * TB, (2 * c + 1) * TB, (2 * c + 2) * TB
                op = jnp.concatenate([h2[lo:mid, :], h2[mid:hi, :]], axis=-1)
                d = jnp.dot(op, wf1p_ref[c], preferred_element_type=jnp.float32)
                z = d if z is None else z + d
            if HAS_REM:
                d = jnp.dot(h2[(T2 - 1) * TB:T2 * TB, :], wf1r_ref[...],
                            preferred_element_type=jnp.float32)
                z = d if z is None else z + d
            z = _gelu(z + bf1_ref[...]).astype(jnp.bfloat16)            # (TB, 256)

            # ---- Remaining head layers, block-diagonal actor||critic fusion -
            # (Dropout -> identity in eval mode.)
            z = _gelu(jnp.dot(z, wf2_ref[...], preferred_element_type=jnp.float32)
                      + bf2_ref[...]).astype(jnp.bfloat16)              # (TB, 512)
            z = _gelu(jnp.dot(z, wf3_ref[...], preferred_element_type=jnp.float32)
                      + bf3_ref[...]).astype(jnp.bfloat16)              # (TB, 128)
            out_ref[...] = (jnp.dot(z, wf4_ref[...], preferred_element_type=jnp.float32)
                            + bf4_ref[...]).astype(jnp.float32)         # (TB, 128) f32
        return kernel

    def forward(x, params):
        B = x.shape[0]
        Bp16 = _round_up(B, 16)
        if Bp16 > block_batch:
            TB = block_batch
            Bp = _round_up(B, TB)
        else:
            # Keep TB a multiple of 16 (bf16 sublane tile) and force >= 2 grid steps so
            # both v7x TensorCores are used even for small batches.
            TB = max(16, Bp16 // 2)
            Bp = 2 * TB
        NB = Bp // TB

        # ---- wrapper-side glue (fused under jit): pad batch, im2col conv1, ----
        # ---- rearrange each block to time-major rows, cast to bf16. -----------
        if Bp != B:
            x = jnp.pad(x, ((0, Bp - B), (0, 0), (0, 0)))
        # xc[b, t, dk*F + f] = x[b, t + dk, f]
        xc = jnp.concatenate([x[:, dk:dk + T1, :] for dk in range(K1)], axis=-1)
        xc = (xc.reshape(NB, TB, T1, KF)
                .transpose(0, 2, 1, 3)            # (NB, T1, TB, KF)
                .reshape(NB, T1 * TB, KF)
                .astype(jnp.bfloat16))

        def const_spec(a):
            nd = a.ndim
            return pl.BlockSpec(a.shape, lambda b, _nd=nd: (0,) * _nd)

        in_specs = [pl.BlockSpec((1, T1 * TB, KF), lambda b: (b, 0, 0))]
        in_specs += [const_spec(w) for w in params]
        out_spec = pl.BlockSpec((TB, OUT_W), lambda b: (b, 0))

        out = pl.pallas_call(
            _make_kernel(TB),
            out_shape=jax.ShapeDtypeStruct((Bp, OUT_W), jnp.float32),
            grid_spec=pltpu.PrefetchScalarGridSpec(
                num_scalar_prefetch=0,
                grid=(NB,),
                in_specs=in_specs,
                out_specs=out_spec),
            compiler_params=pltpu.CompilerParams(
                dimension_semantics=("parallel",),
                vmem_limit_bytes=48 * 1024 * 1024),
        )(xc, *params)

        logits = out[:B, :action_dim]
        values = out[:B, VALUE_LANE:VALUE_LANE + 1]
        return logits, values

    return jax.jit(forward)


def init_torch_params(key, window_size, n_features, action_dim,
                      n_filters=(64, 128), kernel_sizes=(3, 2), std=0.05):
    """Deterministic synthetic parameters in PyTorch tensor convention.

    (PyTorch uses orthogonal init + zero bias; here scaled normals + zero bias.)
    """
    K1, K2 = kernel_sizes
    C1, C2 = n_filters
    T1 = window_size - K1 + 1
    T2 = T1 - K2 + 1
    flat = C2 * T2
    ks = jax.random.split(key, 10)

    def lin(k, o, i):
        return jax.random.normal(k, (o, i), jnp.float32) * std

    return dict(
        w_conv1=jax.random.normal(ks[0], (C1, n_features, K1), jnp.float32) * std,
        w_conv2=jax.random.normal(ks[1], (C2, C1, K2), jnp.float32) * std,
        wa1=lin(ks[2], 128, flat), wa2=lin(ks[3], 256, 128),
        wa3=lin(ks[4], 57, 256), wa4=lin(ks[5], action_dim, 57),
        wc1=lin(ks[6], 128, flat), wc2=lin(ks[7], 256, 128),
        wc3=lin(ks[8], 57, 256), wc4=lin(ks[9], 1, 57),
    )


def to_kernel_params(tp, window_size, n_features, action_dim,
                     n_filters=(64, 128), kernel_sizes=(3, 2)):
    """Convert PyTorch-convention tensors to the fused kernel layout (pre-cast once)."""
    K1, K2 = kernel_sizes
    C1, C2 = n_filters
    T1 = window_size - K1 + 1
    T2 = T1 - K2 + 1
    npair = T2 // 2
    bias = lambda n: jnp.zeros((1, n), jnp.float32)

    # conv1 as im2col matmul weight: W1[dk*F + f, c_out] = w_conv1[c_out, f, dk]
    W1 = jnp.transpose(tp["w_conv1"], (2, 1, 0)).reshape(K1 * n_features, C1)
    # conv2 taps fused on the contraction axis: W2[dk*C1 + c_in, c_out] = w_conv2[c_out, c_in, dk]
    W2 = jnp.transpose(tp["w_conv2"], (2, 1, 0)).reshape(K2 * C1, C2)

    # First FC, actor||critic fused on the output lanes.  Realizes torch's
    # channel-major flatten: Wf1[l, c, o] = w[o, c*T2 + l].
    def fc1_to_3d(w):
        return w.T.reshape(C2, T2, 128).transpose(1, 0, 2)
    Wf1 = jnp.concatenate([fc1_to_3d(tp["wa1"]), fc1_to_3d(tp["wc1"])], axis=-1)  # (T2, C2, 256)

    # Pair adjacent time taps -> (npair, 2*C2, 256); odd remainder tap kept separate.
    if npair > 0:
        Wf1p = jnp.concatenate([Wf1[0:2 * npair:2], Wf1[1:2 * npair:2]], axis=1)
    else:
        Wf1p = jnp.zeros((1, 2 * C2, 256), jnp.float32)
    Wf1r = Wf1[-1] if T2 % 2 == 1 else jnp.zeros((C2, 256), jnp.float32)

    # Block-diagonal fusion of the remaining head layers (57-wide layer padded to 64).
    Wf2 = jnp.zeros((256, 512), jnp.float32)
    Wf2 = Wf2.at[:128, :256].set(tp["wa2"].T).at[128:, 256:].set(tp["wc2"].T)
    Wf3 = jnp.zeros((512, 128), jnp.float32)
    Wf3 = Wf3.at[:256, :57].set(tp["wa3"].T).at[256:, 64:64 + 57].set(tp["wc3"].T)
    Wf4 = jnp.zeros((128, 128), jnp.float32)
    Wf4 = Wf4.at[:57, :action_dim].set(tp["wa4"].T).at[64:64 + 57, 64:65].set(tp["wc4"].T)

    bf16 = lambda a: a.astype(jnp.bfloat16)
    return [bf16(W1), bias(C1), bf16(W2), bias(C2),
            bf16(Wf1p), bf16(Wf1r), bias(256),
            bf16(Wf2), bias(512), bf16(Wf3), bias(128), bf16(Wf4), bias(128)]


def reference_forward(x, tp, kernel_sizes=(3, 2)):
    """Pure-JAX f32 reference of the PyTorch forward (eval mode, exact-erf GELU)."""
    K1, K2 = kernel_sizes
    w1, w2 = tp["w_conv1"], tp["w_conv2"]
    T1 = x.shape[1] - K1 + 1
    T2 = T1 - K2 + 1
    h = sum(jnp.einsum("btf,cf->btc", x[:, dk:dk + T1, :], w1[:, :, dk])
            for dk in range(K1))
    h = _gelu_exact(h)
    h2 = sum(jnp.einsum("btc,dc->btd", h[:, dk:dk + T2, :], w2[:, :, dk])
             for dk in range(K2))
    h2 = _gelu_exact(h2)
    flat = jnp.transpose(h2, (0, 2, 1)).reshape(x.shape[0], -1)  # torch channel-major flatten

    def head(w_1, w_2, w_3, w_4):
        z = _gelu_exact(flat @ w_1.T)
        z = _gelu_exact(z @ w_2.T)
        z = _gelu_exact(z @ w_3.T)
        return z @ w_4.T

    return (head(tp["wa1"], tp["wa2"], tp["wa3"], tp["wa4"]),
            head(tp["wc1"], tp["wc2"], tp["wc3"], tp["wc4"]))


if __name__ == "__main__":
    # Small shapes consistent with the module: x is (batch, window_size, n_features)
    B, WINDOW, FEATURES, ACTION_DIM = 2, 16, 4, 3

    key = jax.random.PRNGKey(0)
    key_x, key_p = jax.random.split(key)

    x = jax.random.normal(key_x, (B, WINDOW, FEATURES), jnp.float32)
    torch_params = init_torch_params(key_p, WINDOW, FEATURES, ACTION_DIM)
    params = to_kernel_params(torch_params, WINDOW, FEATURES, ACTION_DIM)

    forward = make_actor_critic_cnn(WINDOW, FEATURES, ACTION_DIM)
    action_logits, values = forward(x, params)
    jax.block_until_ready((action_logits, values))

    assert action_logits.shape == (B, ACTION_DIM), action_logits.shape
    assert values.shape == (B, 1), values.shape
    assert bool(jnp.all(jnp.isfinite(action_logits)))
    assert bool(jnp.all(jnp.isfinite(values)))

    # Numerical sanity check vs pure-JAX f32 / exact-erf reference (kernel runs bf16
    # MXU + bf16 tanh-approx GELU, so allow a small, scale-relative tolerance).
    ref_logits, ref_values = reference_forward(x, torch_params)

    def close(a, b, rtol=0.05, atol=1e-4):
        scale = float(jnp.max(jnp.abs(b)))
        return float(jnp.max(jnp.abs(jnp.asarray(a, jnp.float32) - b))) <= rtol * scale + atol

    assert close(action_logits, ref_logits), "actor head mismatch vs reference"
    assert close(values, ref_values), "critic head mismatch vs reference"

    print("KERNEL_OK")
</pallas_src>

<mosaic_0001>
module attributes {stable_mosaic.version = 11 : i64} {
  func.func @kernel(%arg0: i32, %arg1: memref<1x224x12xbf16, #tpu.memory_space<vmem>>, %arg2: memref<12x64xbf16, #tpu.memory_space<vmem>>, %arg3: memref<1x64xf32, #tpu.memory_space<vmem>>, %arg4: memref<128x128xbf16, #tpu.memory_space<vmem>>, %arg5: memref<1x128xf32, #tpu.memory_space<vmem>>, %arg6: memref<6x256x256xbf16, #tpu.memory_space<vmem>>, %arg7: memref<128x256xbf16, #tpu.memory_space<vmem>>, %arg8: memref<1x256xf32, #tpu.memory_space<vmem>>, %arg9: memref<256x512xbf16, #tpu.memory_space<vmem>>, %arg10: memref<1x512xf32, #tpu.memory_space<vmem>>, %arg11: memref<512x128xbf16, #tpu.memory_space<vmem>>, %arg12: memref<1x128xf32, #tpu.memory_space<vmem>>, %arg13: memref<128x128xbf16, #tpu.memory_space<vmem>>, %arg14: memref<1x128xf32, #tpu.memory_space<vmem>>, %arg15: memref<16x128xf32, #tpu.memory_space<vmem>>) attributes {dimension_semantics = [#tpu.dimension_semantics<parallel>], iteration_bounds = array<i64: 2>, scalar_prefetch = 0 : i64, scratch_operands = 0 : i64, tpu.core_type = #tpu.core_type<tc>, window_params = [{transform_indices = @transform_0, window_bounds = array<i64: 1, 224, 12>}, {pipeline_mode = #tpu.pipeline_mode<synchronous>, transform_indices = @transform_1, window_bounds = array<i64: 12, 64>}, {pipeline_mode = #tpu.pipeline_mode<synchronous>, transform_indices = @transform_2, window_bounds = array<i64: 1, 64>}, {pipeline_mode = #tpu.pipeline_mode<synchronous>, transform_indices = @transform_3, window_bounds = array<i64: 128, 128>}, {pipeline_mode = #tpu.pipeline_mode<synchronous>, transform_indices = @transform_4, window_bounds = array<i64: 1, 128>}, {pipeline_mode = #tpu.pipeline_mode<synchronous>, transform_indices = @transform_5, window_bounds = array<i64: 6, 256, 256>}, {pipeline_mode = #tpu.pipeline_mode<synchronous>, transform_indices = @transform_6, window_bounds = array<i64: 128, 256>}, {pipeline_mode = #tpu.pipeline_mode<synchronous>, transform_indices = @transform_7, window_bounds = array<i64: 1, 256>}, {pipeline_mode = #tpu.pipeline_mode<synchronous>, transform_indices = @transform_8, window_bounds = array<i64: 256, 512>}, {pipeline_mode = #tpu.pipeline_mode<synchronous>, transform_indices = @transform_9, window_bounds = array<i64: 1, 512>}, {pipeline_mode = #tpu.pipeline_mode<synchronous>, transform_indices = @transform_10, window_bounds = array<i64: 512, 128>}, {pipeline_mode = #tpu.pipeline_mode<synchronous>, transform_indices = @transform_11, window_bounds = array<i64: 1, 128>}, {pipeline_mode = #tpu.pipeline_mode<synchronous>, transform_indices = @transform_12, window_bounds = array<i64: 128, 128>}, {pipeline_mode = #tpu.pipeline_mode<synchronous>, transform_indices = @transform_13, window_bounds = array<i64: 1, 128>}, {transform_indices = @transform_14, window_bounds = array<i64: 16, 128>}]} {
    %c0 = arith.constant 0 : index
    %c0_0 = arith.constant 0 : index
    %c0_1 = arith.constant 0 : index
    %0 = vector.load %arg1[%c0, %c0_0, %c0_1] : memref<1x224x12xbf16, #tpu.memory_space<vmem>>, vector<1x224x12xbf16>
    %1 = vector.shape_cast %0 : vector<1x224x12xbf16> to vector<224x12xbf16>
    %c0_2 = arith.constant 0 : index
    %c0_3 = arith.constant 0 : index
    %2 = vector.load %arg2[%c0_2, %c0_3] : memref<12x64xbf16, #tpu.memory_space<vmem>>, vector<12x64xbf16>
    %cst = arith.constant dense<0.000000e+00> : vector<224x64xf32>
    %3 = tpu.matmul %1, %2, %cst {dimension_numbers = #tpu.dot_dimension_numbers<[1], [0], [0], [1], [0, 0, 1, 1], [], []>} : vector<224x12xbf16>, vector<12x64xbf16>, vector<224x64xf32> -> vector<224x64xf32>
    %c0_4 = arith.constant 0 : index
    %c0_5 = arith.constant 0 : index
    %4 = vector.load %arg3[%c0_4, %c0_5] : memref<1x64xf32, #tpu.memory_space<vmem>>, vector<1x64xf32>
    %5 = vector.broadcast %4 : vector<1x64xf32> to vector<224x64xf32>
    %6 = arith.addf %3, %5 : vector<224x64xf32>
    %7 = arith.truncf %6 : vector<224x64xf32> to vector<224x64xbf16>
    %8 = arith.mulf %7, %7 : vector<224x64xbf16>
    %9 = arith.mulf %7, %8 : vector<224x64xbf16>
    %cst_6 = arith.constant 4.467770e-02 : bf16
    %10 = vector.broadcast %cst_6 : bf16 to vector<224x64xbf16>
    %11 = arith.mulf %10, %9 : vector<224x64xbf16>
    %12 = arith.addf %7, %11 : vector<224x64xbf16>
    %cst_7 = arith.constant 7.968750e-01 : bf16
    %13 = vector.broadcast %cst_7 : bf16 to vector<224x64xbf16>
    %14 = arith.mulf %13, %12 : vector<224x64xbf16>
    %15 = math.tanh %14 : vector<224x64xbf16>
    %cst_8 = arith.constant 1.000000e+00 : bf16
    %16 = vector.broadcast %cst_8 : bf16 to vector<224x64xbf16>
    %17 = arith.addf %16, %15 : vector<224x64xbf16>
    %cst_9 = arith.constant 5.000000e-01 : bf16
    %18 = vector.broadcast %cst_9 : bf16 to vector<224x64xbf16>
    %19 = arith.mulf %18, %17 : vector<224x64xbf16>
    %20 = arith.mulf %7, %19 : vector<224x64xbf16>
    %21 = vector.extract_strided_slice %20 {offsets = [0, 0], sizes = [208, 64], strides = [1, 1]} : vector<224x64xbf16> to vector<208x64xbf16>
    %22 = vector.extract_strided_slice %20 {offsets = [16, 0], sizes = [208, 64], strides = [1, 1]} : vector<224x64xbf16> to vector<208x64xbf16>
    %23 = tpu.concatenate %21, %22 in 1 : vector<208x64xbf16>, vector<208x64xbf16> -> vector<208x128xbf16>
    %c0_10 = arith.constant 0 : index
    %c0_11 = arith.constant 0 : index
    %24 = vector.load %arg4[%c0_10, %c0_11] : memref<128x128xbf16, #tpu.memory_space<vmem>>, vector<128x128xbf16>
    %cst_12 = arith.constant dense<0.000000e+00> : vector<208x128xf32>
    %25 = tpu.matmul %23, %24, %cst_12 {dimension_numbers = #tpu.dot_dimension_numbers<[1], [0], [0], [1], [0, 0, 1, 1], [], []>} : vector<208x128xbf16>, vector<128x128xbf16>, vector<208x128xf32> -> vector<208x128xf32>
    %c0_13 = arith.constant 0 : index
    %c0_14 = arith.constant 0 : index
    %26 = vector.load %arg5[%c0_13, %c0_14] : memref<1x128xf32, #tpu.memory_space<vmem>>, vector<1x128xf32>
    %27 = vector.broadcast %26 : vector<1x128xf32> to vector<208x128xf32>
    %28 = arith.addf %25, %27 : vector<208x128xf32>
    %29 = arith.truncf %28 : vector<208x128xf32> to vector<208x128xbf16>
    %30 = arith.mulf %29, %29 : vector<208x128xbf16>
    %31 = arith.mulf %29, %30 : vector<208x128xbf16>
    %cst_15 = arith.constant 4.467770e-02 : bf16
    %32 = vector.broadcast %cst_15 : bf16 to vector<208x128xbf16>
    %33 = arith.mulf %32, %31 : vector<208x128xbf16>
    %34 = arith.addf %29, %33 : vector<208x128xbf16>
    %cst_16 = arith.constant 7.968750e-01 : bf16
    %35 = vector.broadcast %cst_16 : bf16 to vector<208x128xbf16>
    %36 = arith.mulf %35, %34 : vector<208x128xbf16>
    %37 = math.tanh %36 : vector<208x128xbf16>
    %cst_17 = arith.constant 1.000000e+00 : bf16
    %38 = vector.broadcast %cst_17 : bf16 to vector<208x128xbf16>
    %39 = arith.addf %38, %37 : vector<208x128xbf16>
    %cst_18 = arith.constant 5.000000e-01 : bf16
    %40 = vector.broadcast %cst_18 : bf16 to vector<208x128xbf16>
    %41 = arith.mulf %40, %39 : vector<208x128xbf16>
    %42 = arith.mulf %29, %41 : vector<208x128xbf16>
    %43 = vector.extract_strided_slice %42 {offsets = [0, 0], sizes = [16, 128], strides = [1, 1]} : vector<208x128xbf16> to vector<16x128xbf16>
    %44 = vector.extract_strided_slice %42 {offsets = [16, 0], sizes = [16, 128], strides = [1, 1]} : vector<208x128xbf16> to vector<16x128xbf16>
    %45 = tpu.concatenate %43, %44 in 1 : vector<16x128xbf16>, vector<16x128xbf16> -> vector<16x256xbf16>
    %c0_19 = arith.constant 0 : index
    %c0_20 = arith.constant 0 : index
    %c0_21 = arith.constant 0 : index
    %46 = vector.load %arg6[%c0_19, %c0_20, %c0_21] : memref<6x256x256xbf16, #tpu.memory_space<vmem>>, vector<1x256x256xbf16>
    %47 = vector.shape_cast %46 : vector<1x256x256xbf16> to vector<256x256xbf16>
    %cst_22 = arith.constant dense<0.000000e+00> : vector<16x256xf32>
    %48 = tpu.matmul %45, %47, %cst_22 {dimension_numbers = #tpu.dot_dimension_numbers<[1], [0], [0], [1], [0, 0, 1, 1], [], []>} : vector<16x256xbf16>, vector<256x256xbf16>, vector<16x256xf32> -> vector<16x256xf32>
    %49 = vector.extract_strided_slice %42 {offsets = [32, 0], sizes = [16, 128], strides = [1, 1]} : vector<208x128xbf16> to vector<16x128xbf16>
    %50 = vector.extract_strided_slice %42 {offsets = [48, 0], sizes = [16, 128], strides = [1, 1]} : vector<208x128xbf16> to vector<16x128xbf16>
    %51 = tpu.concatenate %49, %50 in 1 : vector<16x128xbf16>, vector<16x128xbf16> -> vector<16x256xbf16>
    %c1 = arith.constant 1 : index
    %c0_23 = arith.constant 0 : index
    %c0_24 = arith.constant 0 : index
    %52 = vector.load %arg6[%c1, %c0_23, %c0_24] : memref<6x256x256xbf16, #tpu.memory_space<vmem>>, vector<1x256x256xbf16>
    %53 = vector.shape_cast %52 : vector<1x256x256xbf16> to vector<256x256xbf16>
    %cst_25 = arith.constant dense<0.000000e+00> : vector<16x256xf32>
    %54 = tpu.matmul %51, %53, %cst_25 {dimension_numbers = #tpu.dot_dimension_numbers<[1], [0], [0], [1], [0, 0, 1, 1], [], []>} : vector<16x256xbf16>, vector<256x256xbf16>, vector<16x256xf32> -> vector<16x256xf32>
    %55 = arith.addf %48, %54 : vector<16x256xf32>
    %56 = vector.extract_strided_slice %42 {offsets = [64, 0], sizes = [16, 128], strides = [1, 1]} : vector<208x128xbf16> to vector<16x128xbf16>
    %57 = vector.extract_strided_slice %42 {offsets = [80, 0], sizes = [16, 128], strides = [1, 1]} : vector<208x128xbf16> to vector<16x128xbf16>
    %58 = tpu.concatenate %56, %57 in 1 : vector<16x128xbf16>, vector<16x128xbf16> -> vector<16x256xbf16>
    %c2 = arith.constant 2 : index
    %c0_26 = arith.constant 0 : index
    %c0_27 = arith.constant 0 : index
    %59 = vector.load %arg6[%c2, %c0_26, %c0_27] : memref<6x256x256xbf16, #tpu.memory_space<vmem>>, vector<1x256x256xbf16>
    %60 = vector.shape_cast %59 : vector<1x256x256xbf16> to vector<256x256xbf16>
    %cst_28 = arith.constant dense<0.000000e+00> : vector<16x256xf32>
    %61 = tpu.matmul %58, %60, %cst_28 {dimension_numbers = #tpu.dot_dimension_numbers<[1], [0], [0], [1], [0, 0, 1, 1], [], []>} : vector<16x256xbf16>, vector<256x256xbf16>, vector<16x256xf32> -> vector<16x256xf32>
    %62 = arith.addf %55, %61 : vector<16x256xf32>
    %63 = vector.extract_strided_slice %42 {offsets = [96, 0], sizes = [16, 128], strides = [1, 1]} : vector<208x128xbf16> to vector<16x128xbf16>
    %64 = vector.extract_strided_slice %42 {offsets = [112, 0], sizes = [16, 128], strides = [1, 1]} : vector<208x128xbf16> to vector<16x128xbf16>
    %65 = tpu.concatenate %63, %64 in 1 : vector<16x128xbf16>, vector<16x128xbf16> -> vector<16x256xbf16>
    %c3 = arith.constant 3 : index
    %c0_29 = arith.constant 0 : index
    %c0_30 = arith.constant 0 : index
    %66 = vector.load %arg6[%c3, %c0_29, %c0_30] : memref<6x256x256xbf16, #tpu.memory_space<vmem>>, vector<1x256x256xbf16>
    %67 = vector.shape_cast %66 : vector<1x256x256xbf16> to vector<256x256xbf16>
    %cst_31 = arith.constant dense<0.000000e+00> : vector<16x256xf32>
    %68 = tpu.matmul %65, %67, %cst_31 {dimension_numbers = #tpu.dot_dimension_numbers<[1], [0], [0], [1], [0, 0, 1, 1], [], []>} : vector<16x256xbf16>, vector<256x256xbf16>, vector<16x256xf32> -> vector<16x256xf32>
    %69 = arith.addf %62, %68 : vector<16x256xf32>
    %70 = vector.extract_strided_slice %42 {offsets = [128, 0], sizes = [16, 128], strides = [1, 1]} : vector<208x128xbf16> to vector<16x128xbf16>
    %71 = vector.extract_strided_slice %42 {offsets = [144, 0], sizes = [16, 128], strides = [1, 1]} : vector<208x128xbf16> to vector<16x128xbf16>
    %72 = tpu.concatenate %70, %71 in 1 : vector<16x128xbf16>, vector<16x128xbf16> -> vector<16x256xbf16>
    %c4 = arith.constant 4 : index
    %c0_32 = arith.constant 0 : index
    %c0_33 = arith.constant 0 : index
    %73 = vector.load %arg6[%c4, %c0_32, %c0_33] : memref<6x256x256xbf16, #tpu.memory_space<vmem>>, vector<1x256x256xbf16>
    %74 = vector.shape_cast %73 : vector<1x256x256xbf16> to vector<256x256xbf16>
    %cst_34 = arith.constant dense<0.000000e+00> : vector<16x256xf32>
    %75 = tpu.matmul %72, %74, %cst_34 {dimension_numbers = #tpu.dot_dimension_numbers<[1], [0], [0], [1], [0, 0, 1, 1], [], []>} : vector<16x256xbf16>, vector<256x256xbf16>, vector<16x256xf32> -> vector<16x256xf32>
    %76 = arith.addf %69, %75 : vector<16x256xf32>
    %77 = vector.extract_strided_slice %42 {offsets = [160, 0], sizes = [16, 128], strides = [1, 1]} : vector<208x128xbf16> to vector<16x128xbf16>
    %78 = vector.extract_strided_slice %42 {offsets = [176, 0], sizes = [16, 128], strides = [1, 1]} : vector<208x128xbf16> to vector<16x128xbf16>
    %79 = tpu.concatenate %77, %78 in 1 : vector<16x128xbf16>, vector<16x128xbf16> -> vector<16x256xbf16>
    %c5 = arith.constant 5 : index
    %c0_35 = arith.constant 0 : index
    %c0_36 = arith.constant 0 : index
    %80 = vector.load %arg6[%c5, %c0_35, %c0_36] : memref<6x256x256xbf16, #tpu.memory_space<vmem>>, vector<1x256x256xbf16>
    %81 = vector.shape_cast %80 : vector<1x256x256xbf16> to vector<256x256xbf16>
    %cst_37 = arith.constant dense<0.000000e+00> : vector<16x256xf32>
    %82 = tpu.matmul %79, %81, %cst_37 {dimension_numbers = #tpu.dot_dimension_numbers<[1], [0], [0], [1], [0, 0, 1, 1], [], []>} : vector<16x256xbf16>, vector<256x256xbf16>, vector<16x256xf32> -> vector<16x256xf32>
    %83 = arith.addf %76, %82 : vector<16x256xf32>
    %84 = vector.extract_strided_slice %42 {offsets = [192, 0], sizes = [16, 128], strides = [1, 1]} : vector<208x128xbf16> to vector<16x128xbf16>
    %c0_38 = arith.constant 0 : index
    %c0_39 = arith.constant 0 : index
    %85 = vector.load %arg7[%c0_38, %c0_39] : memref<128x256xbf16, #tpu.memory_space<vmem>>, vector<128x256xbf16>
    %cst_40 = arith.constant dense<0.000000e+00> : vector<16x256xf32>
    %86 = tpu.matmul %84, %85, %cst_40 {dimension_numbers = #tpu.dot_dimension_numbers<[1], [0], [0], [1], [0, 0, 1, 1], [], []>} : vector<16x128xbf16>, vector<128x256xbf16>, vector<16x256xf32> -> vector<16x256xf32>
    %87 = arith.addf %83, %86 : vector<16x256xf32>
    %c0_41 = arith.constant 0 : index
    %c0_42 = arith.constant 0 : index
    %88 = vector.load %arg8[%c0_41, %c0_42] : memref<1x256xf32, #tpu.memory_space<vmem>>, vector<1x256xf32>
    %89 = vector.broadcast %88 : vector<1x256xf32> to vector<16x256xf32>
    %90 = arith.addf %87, %89 : vector<16x256xf32>
    %91 = arith.truncf %90 : vector<16x256xf32> to vector<16x256xbf16>
    %92 = arith.mulf %91, %91 : vector<16x256xbf16>
    %93 = arith.mulf %91, %92 : vector<16x256xbf16>
    %cst_43 = arith.constant 4.467770e-02 : bf16
    %94 = vector.broadcast %cst_43 : bf16 to vector<16x256xbf16>
    %95 = arith.mulf %94, %93 : vector<16x256xbf16>
    %96 = arith.addf %91, %95 : vector<16x256xbf16>
    %cst_44 = arith.constant 7.968750e-01 : bf16
    %97 = vector.broadcast %cst_44 : bf16 to vector<16x256xbf16>
    %98 = arith.mulf %97, %96 : vector<16x256xbf16>
    %99 = math.tanh %98 : vector<16x256xbf16>
    %cst_45 = arith.constant 1.000000e+00 : bf16
    %100 = vector.broadcast %cst_45 : bf16 to vector<16x256xbf16>
    %101 = arith.addf %100, %99 : vector<16x256xbf16>
    %cst_46 = arith.constant 5.000000e-01 : bf16
    %102 = vector.broadcast %cst_46 : bf16 to vector<16x256xbf16>
    %103 = arith.mulf %102, %101 : vector<16x256xbf16>
    %104 = arith.mulf %91, %103 : vector<16x256xbf16>
    %c0_47 = arith.constant 0 : index
    %c0_48 = arith.constant 0 : index
    %105 = vector.load %arg9[%c0_47, %c0_48] : memref<256x512xbf16, #tpu.memory_space<vmem>>, vector<256x512xbf16>
    %cst_49 = arith.constant dense<0.000000e+00> : vector<16x512xf32>
    %106 = tpu.matmul %104, %105, %cst_49 {dimension_numbers = #tpu.dot_dimension_numbers<[1], [0], [0], [1], [0, 0, 1, 1], [], []>} : vector<16x256xbf16>, vector<256x512xbf16>, vector<16x512xf32> -> vector<16x512xf32>
    %c0_50 = arith.constant 0 : index
    %c0_51 = arith.constant 0 : index
    %107 = vector.load %arg10[%c0_50, %c0_51] : memref<1x512xf32, #tpu.memory_space<vmem>>, vector<1x512xf32>
    %108 = vector.broadcast %107 : vector<1x512xf32> to vector<16x512xf32>
    %109 = arith.addf %106, %108 : vector<16x512xf32>
    %110 = arith.truncf %109 : vector<16x512xf32> to vector<16x512xbf16>
    %111 = arith.mulf %110, %110 : vector<16x512xbf16>
    %112 = arith.mulf %110, %111 : vector<16x512xbf16>
    %cst_52 = arith.constant 4.467770e-02 : bf16
    %113 = vector.broadcast %cst_52 : bf16 to vector<16x512xbf16>
    %114 = arith.mulf %113, %112 : vector<16x512xbf16>
    %115 = arith.addf %110, %114 : vector<16x512xbf16>
    %cst_53 = arith.constant 7.968750e-01 : bf16
    %116 = vector.broadcast %cst_53 : bf16 to vector<16x512xbf16>
    %117 = arith.mulf %116, %115 : vector<16x512xbf16>
    %118 = math.tanh %117 : vector<16x512xbf16>
    %cst_54 = arith.constant 1.000000e+00 : bf16
    %119 = vector.broadcast %cst_54 : bf16 to vector<16x512xbf16>
    %120 = arith.addf %119, %118 : vector<16x512xbf16>
    %cst_55 = arith.constant 5.000000e-01 : bf16
    %121 = vector.broadcast %cst_55 : bf16 to vector<16x512xbf16>
    %122 = arith.mulf %121, %120 : vector<16x512xbf16>
    %123 = arith.mulf %110, %122 : vector<16x512xbf16>
    %c0_56 = arith.constant 0 : index
    %c0_57 = arith.constant 0 : index
    %124 = vector.load %arg11[%c0_56, %c0_57] : memref<512x128xbf16, #tpu.memory_space<vmem>>, vector<512x128xbf16>
    %cst_58 = arith.constant dense<0.000000e+00> : vector<16x128xf32>
    %125 = tpu.matmul %123, %124, %cst_58 {dimension_numbers = #tpu.dot_dimension_numbers<[1], [0], [0], [1], [0, 0, 1, 1], [], []>} : vector<16x512xbf16>, vector<512x128xbf16>, vector<16x128xf32> -> vector<16x128xf32>
    %c0_59 = arith.constant 0 : index
    %c0_60 = arith.constant 0 : index
    %126 = vector.load %arg12[%c0_59, %c0_60] : memref<1x128xf32, #tpu.memory_space<vmem>>, vector<1x128xf32>
    %127 = vector.broadcast %126 : vector<1x128xf32> to vector<16x128xf32>
    %128 = arith.addf %125, %127 : vector<16x128xf32>
    %129 = arith.truncf %128 : vector<16x128xf32> to vector<16x128xbf16>
    %130 = arith.mulf %129, %129 : vector<16x128xbf16>
    %131 = arith.mulf %129, %130 : vector<16x128xbf16>
    %cst_61 = arith.constant 4.467770e-02 : bf16
    %132 = vector.broadcast %cst_61 : bf16 to vector<16x128xbf16>
    %133 = arith.mulf %132, %131 : vector<16x128xbf16>
    %134 = arith.addf %129, %133 : vector<16x128xbf16>
    %cst_62 = arith.constant 7.968750e-01 : bf16
    %135 = vector.broadcast %cst_62 : bf16 to vector<16x128xbf16>
    %136 = arith.mulf %135, %134 : vector<16x128xbf16>
    %137 = math.tanh %136 : vector<16x128xbf16>
    %cst_63 = arith.constant 1.000000e+00 : bf16
    %138 = vector.broadcast %cst_63 : bf16 to vector<16x128xbf16>
    %139 = arith.addf %138, %137 : vector<16x128xbf16>
    %cst_64 = arith.constant 5.000000e-01 : bf16
    %140 = vector.broadcast %cst_64 : bf16 to vector<16x128xbf16>
    %141 = arith.mulf %140, %139 : vector<16x128xbf16>
    %142 = arith.mulf %129, %141 : vector<16x128xbf16>
    %c0_65 = arith.constant 0 : index
    %c0_66 = arith.constant 0 : index
    %143 = vector.load %arg13[%c0_65, %c0_66] : memref<128x128xbf16, #tpu.memory_space<vmem>>, vector<128x128xbf16>
    %cst_67 = arith.constant dense<0.000000e+00> : vector<16x128xf32>
    %144 = tpu.matmul %142, %143, %cst_67 {dimension_numbers = #tpu.dot_dimension_numbers<[1], [0], [0], [1], [0, 0, 1, 1], [], []>} : vector<16x128xbf16>, vector<128x128xbf16>, vector<16x128xf32> -> vector<16x128xf32>
    %c0_68 = arith.constant 0 : index
    %c0_69 = arith.constant 0 : index
    %145 = vector.load %arg14[%c0_68, %c0_69] : memref<1x128xf32, #tpu.memory_space<vmem>>, vector<1x128xf32>
    %146 = vector.broadcast %145 : vector<1x128xf32> to vector<16x128xf32>
    %147 = arith.addf %144, %146 : vector<16x128xf32>
    %c0_70 = arith.constant 0 : index
    %c0_71 = arith.constant 0 : index
    %148 = vector.load %arg15[%c0_70, %c0_71] : memref<16x128xf32, #tpu.memory_space<vmem>>, vector<16x128xf32>
    tpu.vector_store %arg15[%c0_70, %c0_71], %147 {strides = array<i32>} : memref<16x128xf32, #tpu.memory_space<vmem>>, vector<16x128xf32>,
    return
  }
  func.func @transform_0(%arg0: i32) -> (i32, i32, i32) {
    %c0_i32 = arith.constant 0 : i32
    %c0_i32_0 = arith.constant 0 : i32
    %c0_i32_1 = arith.constant 0 : i32
    return %arg0, %c0_i32, %c0_i32_0 : i32, i32, i32
  }
  func.func @transform_1(%arg0: i32) -> (i32, i32) {
    %c0_i32 = arith.constant 0 : i32
    %c0_i32_0 = arith.constant 0 : i32
    %c0_i32_1 = arith.constant 0 : i32
    return %c0_i32, %c0_i32_0 : i32, i32
  }
  func.func @transform_2(%arg0: i32) -> (i32, i32) {
    %c0_i32 = arith.constant 0 : i32
    %c0_i32_0 = arith.constant 0 : i32
    %c0_i32_1 = arith.constant 0 : i32
    return %c0_i32, %c0_i32_0 : i32, i32
  }
  func.func @transform_3(%arg0: i32) -> (i32, i32) {
    %c0_i32 = arith.constant 0 : i32
    %c0_i32_0 = arith.constant 0 : i32
    %c0_i32_1 = arith.constant 0 : i32
    return %c0_i32, %c0_i32_0 : i32, i32
  }
  func.func @transform_4(%arg0: i32) -> (i32, i32) {
    %c0_i32 = arith.constant 0 : i32
    %c0_i32_0 = arith.constant 0 : i32
    %c0_i32_1 = arith.constant 0 : i32
    return %c0_i32, %c0_i32_0 : i32, i32
  }
  func.func @transform_5(%arg0: i32) -> (i32, i32, i32) {
    %c0_i32 = arith.constant 0 : i32
    %c0_i32_0 = arith.constant 0 : i32
    %c0_i32_1 = arith.constant 0 : i32
    %c0_i32_2 = arith.constant 0 : i32
    return %c0_i32, %c0_i32_0, %c0_i32_1 : i32, i32, i32
  }
  func.func @transform_6(%arg0: i32) -> (i32, i32) {
    %c0_i32 = arith.constant 0 : i32
    %c0_i32_0 = arith.constant 0 : i32
    %c0_i32_1 = arith.constant 0 : i32
    return %c0_i32, %c0_i32_0 : i32, i32
  }
  func.func @transform_7(%arg0: i32) -> (i32, i32) {
    %c0_i32 = arith.constant 0 : i32
    %c0_i32_0 = arith.constant 0 : i32
    %c0_i32_1 = arith.constant 0 : i32
    return %c0_i32, %c0_i32_0 : i32, i32
  }
  func.func @transform_8(%arg0: i32) -> (i32, i32) {
    %c0_i32 = arith.constant 0 : i32
    %c0_i32_0 = arith.constant 0 : i32
    %c0_i32_1 = arith.constant 0 : i32
    return %c0_i32, %c0_i32_0 : i32, i32
  }
  func.func @transform_9(%arg0: i32) -> (i32, i32) {
    %c0_i32 = arith.constant 0 : i32
    %c0_i32_0 = arith.constant 0 : i32
    %c0_i32_1 = arith.constant 0 : i32
    return %c0_i32, %c0_i32_0 : i32, i32
  }
  func.func @transform_10(%arg0: i32) -> (i32, i32) {
    %c0_i32 = arith.constant 0 : i32
    %c0_i32_0 = arith.constant 0 : i32
    %c0_i32_1 = arith.constant 0 : i32
    return %c0_i32, %c0_i32_0 : i32, i32
  }
  func.func @transform_11(%arg0: i32) -> (i32, i32) {
    %c0_i32 = arith.constant 0 : i32
    %c0_i32_0 = arith.constant 0 : i32
    %c0_i32_1 = arith.constant 0 : i32
    return %c0_i32, %c0_i32_0 : i32, i32
  }
  func.func @transform_12(%arg0: i32) -> (i32, i32) {
    %c0_i32 = arith.constant 0 : i32
    %c0_i32_0 = arith.constant 0 : i32
    %c0_i32_1 = arith.constant 0 : i32
    return %c0_i32, %c0_i32_0 : i32, i32
  }
  func.func @transform_13(%arg0: i32) -> (i32, i32) {
    %c0_i32 = arith.constant 0 : i32
    %c0_i32_0 = arith.constant 0 : i32
    %c0_i32_1 = arith.constant 0 : i32
    return %c0_i32, %c0_i32_0 : i32, i32
  }
  func.func @transform_14(%arg0: i32) -> (i32, i32) {
    %c0_i32 = arith.constant 0 : i32
    %c0_i32_0 = arith.constant 0 : i32
    return %arg0, %c0_i32 : i32, i32
  }
}

</mosaic_0001>

<bundles_post_ra>
// kernel: forward.1
= control target key start
LH: loop header
LB: loop body
LE: loop exit
PB: predicated region body
PF: predicated region fallthrough
CT: control target
= control target key end

     0   :  { %19 = vsyncpa [#allocation3], 0  ;;  %s5326_s29 = smov 0   ;;  %s6198_s0 = inlined_call_operand.vmem [shape: bf16[2,224,12], index: 0, kind: input, shape index: {}]   ;;  %s6199_s1 = inlined_call_operand.vmem [shape: bf16[12,64], index: 1, kind: input, shape index: {}]   ;;  %s6200_s2 = inlined_call_operand.vmem [shape: f32[1,64], index: 2, kind: input, shape index: {}]   ;;  %s6201_s3 = inlined_call_operand.vmem [shape: bf16[128,128], index: 3, kind: input, shape index: {}]   ;;  %s6202_s4 = inlined_call_operand.vmem [shape: f32[1,128], index: 4, kind: input, shape index: {}]   ;;  %s6203_s5 = inlined_call_operand.hbm [shape: bf16[6,256,256], index: 5, kind: input, shape index: {}]   ;;  %s6204_s6 = inlined_call_operand.vmem [shape: bf16[128,256], index: 6, kind: input, shape index: {}]   ;;  %s6205_s7 = inlined_call_operand.vmem [shape: f32[1,256], index: 7, kind: input, shape index: {}]   ;;  %s6206_s8 = inlined_call_operand.vmem [shape: bf16[256,512], index: 8, kind: input, shape index: {}]   ;;  %s6207_s9 = inlined_call_operand.vmem [shape: f32[1,512], index: 9, kind: input, shape index: {}]   ;;  %s6208_s10 = inlined_call_operand.vmem [shape: bf16[512,128], index: 10, kind: input, shape index: {}]   ;;  %s6209_s11 = inlined_call_operand.vmem [shape: f32[1,128], index: 11, kind: input, shape index: {}]   ;;  %s6210_s12 = inlined_call_operand.vmem [shape: bf16[128,128], index: 12, kind: input, shape index: {}]   ;;  %s6211_s13 = inlined_call_operand.vmem [shape: f32[1,128], index: 13, kind: input, shape index: {}]   ;;  %s6212_s14 = inlined_call_operand.vmem [shape: f32[32,128], index: 14, kind: output, shape index: {}]  }
   0x1 LB: > { %s5332_s30 = sadd.s32 4294967295, %s5242_s29   ;;  %p4044_p0 = scmp.ge.s32.totalorder %s5242_s29, 1  ;;  %s5242_s29 = sphi %s5326_s29, %s25_s29  }
   0x2   : > { %p355_p1 = scmp.lt.s32.totalorder %s5242_s29, 3  ;;  %s5244_s15 = smov [#allocation2]  }
   0x3   : > { %s379_s16 = sshll.u32 %s5244_s15, 4  ;;  %p6213_p3 = scmp.eq.s32.totalorder %s5332_s30, 0  ;;  %s380_s16 = int_to_ptr.vmem [resolvable:$true] %s379_s16 }
   0x4   : > { %p5336_p2 = pnand %p4044_p0, %p355_p1  ;;  %s5204_s21 = scalar_lea.hbm %s6203_s5, 24576 }
   0x5   : > { %p5205_p6 = scmp.ne.s32.totalorder %s6203_s5, %s5204_s21  ;;  %p5211_p10 = scmp.lt.u32.totalorder %s5204_s21, %s6203_s5 }
   0x6   : > { %s6215_s17 = scalar_select %p5336_p2, 1, 0 }
   0x7   : > { %p4644_p4 = pneg %p5336_p2 }
   0x9   : > { %p5345_p5 = pnand %p6213_p3, %p4644_p4 }
   0xb   : > { %p5206_p7 = pneg %p5345_p5 }
   0xd   : > { %p5207_p8 = pnand %p5206_p7, %p5205_p6 }
   0xf   : > { %p5208_p9 = pneg %p5207_p8 }
  0x11   : > { %p5213_p11 = pnand %p5211_p10, %p5208_p9 }
  0x13   : > { %5216 = shalt.err (!%p5213_p11)
}
  0x14   : > { %s5217_s26 = scalar_lea.vmem %s380_s16, 24576  ;;  %p5225_p1 = scmp.lt.s32.totalorder %s380_s16, %s380_s16 }
  0x15   : > { %p5218_p12 = scmp.ne.s32.totalorder %s380_s16, %s5217_s26  ;;  %p5226_p4 = scmp.lt.s32.totalorder %s5217_s26, %s5217_s26 }
  0x17   : > { %p5220_p13 = pnand %p5218_p12, %p5206_p7  ;;  %p5227_p3 = por %p5226_p4, %p5225_p1 }
  0x19   : > { %p5221_p0 = pneg %p5220_p13 }
  0x1b   : > { %p5228_p2 = pnand %p5227_p3, %p5221_p0 }
  0x1d   : > { %5231 = shalt.err (!%p5228_p2)
}
  0x1e   : > { %s5245_s27 = smov 128   ;;  %s5246_s28 = smov 8  }
  0x1f   : > { %4647 = dma.hbm_to_vmem [thread:$0]  (!%p5345_p5), %s6203_s5, 24576, %s380_s16, [#allocation3], %s5245_s27, %s5245_s27, %s5246_s28  }
  0x20   : > { %p6217_p6 = scmp.ne.s32.totalorder %s6215_s17, 0 }
  0x21   : > { %p6218_p8 = scmp.eq.s32.totalorder (!%p6217_p6), %s5332_s30, 0 }
  0x22   : > { %427 = sbr.rel (%p6217_p6) target bundleno = 1985 (0x7c1), region = 76 }
  0x29   : > { %5237 = dma.done.wait (%p6218_p8), [#allocation3], 24576   ;;  %p6219_p7 = pmov %p6218_p8 }
  0x2a   : > { %p473_p2 = scmp.lt.s32.totalorder %s5332_s30, 1  ;;  %vm644_vm0 = vcmask 1045504   ;;  %vm601_vm1 = vcmask 97280   ;;  %v4665_v0 = vld [vmem:[%s6199_s1] sm:$0x3f]   ;;  %v5247_v17 = vmov 0.0  }
  0x2b   : > { %5239 = vsyncadd (%p6219_p7), [#allocation3], 4294942720  ;;  %4638 = vmatprep.subr.msk.bf16.mxu0 %vm644_vm0, %v4665_v0  ;;  %v646_v2 = vsel %vm644_vm0, %v4665_v0, 0  ;;  %v4680_v16 = vld [vmem:[%s6201_s3] sm:$0xff]   ;;  %4526 = vmatprep.subr.bf16.mxu1 %v5247_v17  ;;  %v4681_v18 = vld [vmem:[%s6201_s3 + $0x8] sm:$0xff]   ;;  %vm5248_vm2 = vmmov 0  }
  0x2c   : > { %s474_s20 = scalar_select %p473_p2, %s5332_s30, 1  ;;  %4497 = vmatpush3.bf16.msra.mxu0 %v646_v2  ;;  %4527 = vmatpush3.bf16.msra.mxu1 %v4680_v16  ;;  %v4682_v19 = vld [vmem:[%s6201_s3 + $0x10] sm:$0xff]   ;;  %v4683_v20 = vld [vmem:[%s6201_s3 + $0x18] sm:$0xff]   ;;  %v4684_v21 = vld [vmem:[%s6201_s3 + $0x20] sm:$0xff]   ;;  %vm972_vm3 = vcmask 523264  }
  0x2d   : > { %4528 = vmatprep.subr.bf16.mxu1 %v5247_v17  ;;  %v4685_v22 = vld [vmem:[%s6201_s3 + $0x28] sm:$0xff]   ;;  %v4686_v23 = vld [vmem:[%s6201_s3 + $0x30] sm:$0xff]   ;;  %v4687_v24 = vld [vmem:[%s6201_s3 + $0x38] sm:$0xff]   ;;  %4542 = vmatprep.mubr.msk.bf16.mxu1 %vm5248_vm2, %v5247_v17  ;;  %s5249_s28 = smov 64   ;;  %s4050_s25 = sshll.u32 %s5332_s30, 1 }
  0x2e   : > { %s4639_s21 = smul.u32 112, %s474_s20  ;;  %v5444_v25 = vld [vmem:[%s6200_s2] ss:$0 sm:$0xff]  ;;  %p479_p3 = scmp.lt.s32.totalorder %s4050_s25, 3 }
  0x30   : > { %s5376_s23 = scalar_lea.vmem %s6198_s0, %s4639_s21  ;;  %4529 = vmatpush3.bf16.msra.mxu1 %v4681_v18  ;;  %s6221_s25 = smov (!%p479_p3, %s4050_s25), 3 }
  0x31   : > { %v4666_v1 = vld [vmem:[%s5376_s23] sm:$0xff]   ;;  %v4667_v3 = vld [vmem:[%s5376_s23 + $0x8] sm:$0xff]   ;;  %v4668_v4 = vld [vmem:[%s5376_s23 + $0x10] sm:$0xff]   ;;  %4530 = vmatprep.subr.bf16.mxu1 %v5247_v17  ;;  %s4051_s26 = sshll.u32 %s6221_s25, 3 }
  0x32   : > { %4498 = vmatprep.mubr.msk.bf16.mxu0 %vm601_vm1, %v4666_v1  ;;  %v4669_v5 = vld [vmem:[%s5376_s23 + $0x18] sm:$0xff]   ;;  %v4670_v6 = vld [vmem:[%s5376_s23 + $0x20] sm:$0xff]   ;;  %v4671_v7 = vld [vmem:[%s5376_s23 + $0x28] sm:$0xff]   ;;  %s482_s20 = scalar_lea.vmem %s6212_s14, %s4051_s26 }
  0x33   : > { %4499 = vmatmul.mubr.msk.bf16.vlgmr.msra.gmra.mrb[0].mxu0 %vm601_vm1, %v4667_v3  ;;  %v4672_v8 = vld [vmem:[%s5376_s23 + $0x30] sm:$0xff]   ;;  %v4673_v9 = vld [vmem:[%s5376_s23 + $0x38] sm:$0xff]   ;;  %v4674_v10 = vld [vmem:[%s5376_s23 + $0x40] sm:$0xff]  }
  0x34   : > { %4502 = vmatprep.mubr.msk.bf16.mxu0 %vm601_vm1, %v4668_v4  ;;  %v4675_v11 = vld [vmem:[%s5376_s23 + $0x48] sm:$0xff]   ;;  %v4676_v12 = vld [vmem:[%s5376_s23 + $0x50] sm:$0xff]   ;;  %v4677_v13 = vld [vmem:[%s5376_s23 + $0x58] sm:$0xff]   ;;  %4531 = vmatpush3.bf16.msra.mxu1 %v4682_v19 }
  0x35   : > { %v4678_v14 = vld [vmem:[%s5376_s23 + $0x60] sm:$0xff]   ;;  %v4679_v15 = vld [vmem:[%s5376_s23 + $0x68] sm:$0xff]   ;;  %4532 = vmatprep.subr.bf16.mxu1 %v5247_v17 }
  0x38   : > { %4533 = vmatpush3.bf16.msra.mxu1 %v4683_v20 }
  0x39   : > { %4534 = vmatprep.subr.bf16.mxu1 %v5247_v17 }
  0x3b   : > { %4503 = vmatmul.mubr.msk.bf16.gmra.mrb[4].mxu0 %vm601_vm1, %v4669_v5 }
  0x3c   : > { %4506 = vmatprep.mubr.msk.bf16.mxu0 %vm601_vm1, %v4670_v6  ;;  %4535 = vmatpush3.bf16.msra.mxu1 %v4684_v21 }
  0x3d   : > { %4536 = vmatprep.subr.bf16.mxu1 %v5247_v17 }
  0x40   : > { %4537 = vmatpush3.bf16.msra.mxu1 %v4685_v22 }
  0x41   : > { %4538 = vmatprep.subr.bf16.mxu1 %v5247_v17 }
  0x43   : > { %4507 = vmatmul.mubr.msk.bf16.gmra.mrb[8].mxu0 %vm601_vm1, %v4671_v7 }
  0x44   : > { %4510 = vmatprep.mubr.msk.bf16.mxu0 %vm601_vm1, %v4672_v8  ;;  %4539 = vmatpush3.bf16.msra.mxu1 %v4686_v23 }
  0x45   : > { %4540 = vmatprep.subr.bf16.mxu1 %v5247_v17 }
  0x48   : > { %4541 = vmatpush3.bf16.msra.mxu1 %v4687_v24 }
  0x4b   : > { %4511 = vmatmul.mubr.msk.bf16.gmra.mrb[12].mxu0 %vm601_vm1, %v4673_v9 }
  0x4c   : > { %4514 = vmatprep.mubr.msk.bf16.mxu0 %vm601_vm1, %v4674_v10 }
  0x53   : > { %4515 = vmatmul.mubr.msk.bf16.gmra.mrb[16].mxu0 %vm601_vm1, %v4675_v11 }
  0x54   : > { %4518 = vmatprep.mubr.msk.bf16.mxu0 %vm601_vm1, %v4676_v12 }
  0x5b   : > { %4519 = vmatmul.mubr.msk.bf16.gmra.mrb[20].mxu0 %vm601_vm1, %v4677_v13 }
  0x5c   : > { %4522 = vmatprep.mubr.msk.bf16.mxu0 %vm601_vm1, %v4678_v14 }
  0x63   : > { %4523 = vmatmul.mubr.msk.bf16.gmra.mrb[24].mxu0 %vm601_vm1, %v4679_v15 }
 0x106   : > { %v4500_v26 = vpop.f32.mrb[0].mxu0 }
 0x107   : > { %v682_v27 = vpop.f32.mrb[1].mxu0  ;;  %v691_v30 = vadd.f32 %v4500_v26, %v5444_v25 }
 0x108   : > { %v683_v28 = vadd.f32 %v5444_v25, %v682_v27  ;;  %v4501_v29 = vpop.f32.mrb[2].mxu0 }
 0x109   : > { %v694_v31 = vadd.f32 %v4501_v29, %v5444_v25  ;;  %v685_v32 = vpop.f32.mrb[3].mxu0 }
 0x10a   : > { %v686_v33 = vadd.f32 %v5444_v25, %v685_v32 }
 0x10b   : > { %v5450_v34 = vpack.c.bf16 %v694_v31, %v691_v30 }
 0x10c   : > { %v5452_v35 = vpack.c.bf16 %v686_v33, %v683_v28 }
 0x10d   : > { %v808_v36 = vmul.bf16 %v5450_v34, %v5450_v34 }
 0x10e   : > { %v4504_v37 = vpop.f32.mrb[4].mxu0 }
 0x10f   : > { %v698_v38 = vpop.f32.mrb[5].mxu0  ;;  %v822_v39 = vmul.bf16 %v808_v36, %v5450_v34  ;;  %v707_v41 = vadd.f32 %v4504_v37, %v5444_v25 }
 0x110   : > { %v4505_v40 = vpop.f32.mrb[6].mxu0  ;;  %v699_v45 = vadd.f32 %v5444_v25, %v698_v38 }
 0x111   : > { %v710_v42 = vadd.f32 %v4505_v40, %v5444_v25  ;;  %v701_v43 = vpop.f32.mrb[7].mxu0  ;;  %v836_v44 = vmul.bf16 1027030327, %v822_v39 }
 0x112   : > { %v702_v46 = vadd.f32 %v5444_v25, %v701_v43 }
 0x113   : > { %v5461_v47 = vpack.c.bf16 %v710_v42, %v707_v41  ;;  %v850_v48 = vadd.bf16 %v836_v44, %v5450_v34 }
 0x114   : > { %v5464_v49 = vpack.c.bf16 %v702_v46, %v699_v45 }
 0x115   : > { %v810_v50 = vmul.bf16 %v5461_v47, %v5461_v47  ;;  %v864_v51 = vmul.bf16 1061961548, %v850_v48 }
 0x116   : > { %v809_v52 = vmul.bf16 %v5464_v49, %v5464_v49  ;;  %v4508_v53 = vpop.f32.mrb[8].mxu0 }
 0x117   : > { %v723_v54 = vadd.f32 %v4508_v53, %v5444_v25  ;;  %v714_v55 = vpop.f32.mrb[9].mxu0  ;;  %5136 = vtanh.bf16 %v864_v51  ;;  %v824_v56 = vmul.bf16 %v810_v50, %v5461_v47 }
 0x118   : > { %v823_v57 = vmul.bf16 %v809_v52, %v5464_v49  ;;  %v715_v58 = vadd.f32 %v5444_v25, %v714_v55  ;;  %v4509_v59 = vpop.f32.mrb[10].mxu0 }
 0x119   : > { %v726_v60 = vadd.f32 %v4509_v59, %v5444_v25  ;;  %v717_v61 = vpop.f32.mrb[11].mxu0  ;;  %v838_v62 = vmul.bf16 1027030327, %v824_v56 }
 0x11a   : > { %v837_v63 = vmul.bf16 1027030327, %v823_v57  ;;  %v718_v0 = vadd.f32 %v5444_v25, %v717_v61 }
 0x11b   : > { %v5476_v1 = vpack.c.bf16 %v726_v60, %v723_v54  ;;  %v852_v2 = vadd.bf16 %v838_v62, %v5461_v47 }
 0x11c   : > { %v5479_v3 = vpack.c.bf16 %v718_v0, %v715_v58  ;;  %v851_v4 = vadd.bf16 %v837_v63, %v5464_v49 }
 0x11d   : > { %v812_v5 = vmul.bf16 %v5476_v1, %v5476_v1  ;;  %v866_v6 = vmul.bf16 1061961548, %v852_v2 }
 0x11e   : > { %v811_v7 = vmul.bf16 %v5479_v3, %v5479_v3  ;;  %v4512_v8 = vpop.f32.mrb[12].mxu0  ;;  %v865_v9 = vmul.bf16 1061961548, %v851_v4 }
 0x11f   : > { %v826_v10 = vmul.bf16 %v812_v5, %v5476_v1  ;;  %v739_v11 = vadd.f32 %v4512_v8, %v5444_v25  ;;  %v730_v12 = vpop.f32.mrb[13].mxu0  ;;  %5138 = vtanh.bf16 %v866_v6 }
 0x120   : > { %v825_v13 = vmul.bf16 %v811_v7, %v5479_v3  ;;  %v731_v14 = vadd.f32 %v5444_v25, %v730_v12  ;;  %v4513_v15 = vpop.f32.mrb[14].mxu0  ;;  %5140 = vtanh.bf16 %v865_v9 }
 0x121   : > { %v840_v16 = vmul.bf16 1027030327, %v826_v10  ;;  %v742_v18 = vadd.f32 %v4513_v15, %v5444_v25  ;;  %v733_v19 = vpop.f32.mrb[15].mxu0 }
 0x122   : > { %v5137_v20 = vpop.eup %5136  ;;  %v839_v21 = vmul.bf16 1027030327, %v825_v13  ;;  %v734_v22 = vadd.f32 %v5444_v25, %v733_v19 }
 0x123   : > { %v5494_v23 = vpack.c.bf16 %v742_v18, %v739_v11  ;;  %v892_v24 = vadd.bf16 1065369472, %v5137_v20  ;;  %v854_v26 = vadd.bf16 %v840_v16, %v5476_v1 }
 0x124   : > { %v5497_v27 = vpack.c.bf16 %v734_v22, %v731_v14  ;;  %v853_v28 = vadd.bf16 %v839_v21, %v5479_v3 }
 0x125   : > { %v814_v29 = vmul.bf16 %v5494_v23, %v5494_v23  ;;  %v906_v30 = vmul.bf16 1056980736, %v892_v24  ;;  %v868_v31 = vmul.bf16 1061961548, %v854_v26 }
 0x126   : > { %v813_v32 = vmul.bf16 %v5497_v27, %v5497_v27  ;;  %v4516_v33 = vpop.f32.mrb[16].mxu0  ;;  %v867_v36 = vmul.bf16 1061961548, %v853_v28 }
 0x127   : > { %v828_v37 = vmul.bf16 %v814_v29, %v5494_v23  ;;  %v755_v38 = vadd.f32 %v4516_v33, %v5444_v25  ;;  %v746_v39 = vpop.f32.mrb[17].mxu0  ;;  %v5507_v40 = vmul.bf16 %v906_v30, %v5450_v34  ;;  %5142 = vtanh.bf16 %v868_v31 }
 0x128   : > { %v827_v41 = vmul.bf16 %v813_v32, %v5497_v27  ;;  %v747_v42 = vadd.f32 %v5444_v25, %v746_v39  ;;  %v4517_v43 = vpop.f32.mrb[18].mxu0  ;;  %5144 = vtanh.bf16 %v867_v36 }
 0x129   : > { %v842_v44 = vmul.bf16 1027030327, %v828_v37  ;;  %v758_v45 = vadd.f32 %v4517_v43, %v5444_v25  ;;  %946 = vrot.lane.b32.xlu0 %v5507_v40, %s5249_s28  ;;  %v749_v46 = vpop.f32.mrb[19].mxu0 }
 0x12a   : > { %v5139_v48 = vpop.eup %5138  ;;  %v841_v50 = vmul.bf16 1027030327, %v827_v41  ;;  %v750_v34 = vadd.f32 %v5444_v25, %v749_v46 }
 0x12b   : > { %v5141_v51 = vpop.eup %5140  ;;  %v5515_v52 = vpack.c.bf16 %v758_v45, %v755_v38  ;;  %v894_v53 = vadd.bf16 1065369472, %v5139_v48  ;;  %v856_v54 = vadd.bf16 %v842_v44, %v5494_v23 }
 0x12c   : > { %v5518_v55 = vpack.c.bf16 %v750_v34, %v747_v42  ;;  %v893_v56 = vadd.bf16 1065369472, %v5141_v51  ;;  %v855_v57 = vadd.bf16 %v841_v50, %v5497_v27 }
 0x12d   : > { %v816_v58 = vmul.bf16 %v5515_v52, %v5515_v52  ;;  %v908_v59 = vmul.bf16 1056980736, %v894_v53  ;;  %v870_v60 = vmul.bf16 1061961548, %v856_v54 }
 0x12e   : > { %v815_v61 = vmul.bf16 %v5518_v55, %v5518_v55  ;;  %v4520_v62 = vpop.f32.mrb[20].mxu0  ;;  %v907_v63 = vmul.bf16 1056980736, %v893_v56  ;;  %v869_v0 = vmul.bf16 1061961548, %v855_v57 }
 0x12f   : > { %v830_v2 = vmul.bf16 %v816_v58, %v5515_v52  ;;  %v771_v4 = vadd.f32 %v4520_v62, %v5444_v25  ;;  %v762_v5 = vpop.f32.mrb[21].mxu0  ;;  %v5528_v6 = vmul.bf16 %v908_v59, %v5461_v47  ;;  %5146 = vtanh.bf16 %v870_v60 }
 0x130   : > { %v829_v7 = vmul.bf16 %v815_v61, %v5518_v55  ;;  %v763_v8 = vadd.f32 %v5444_v25, %v762_v5  ;;  %v4521_v9 = vpop.f32.mrb[22].mxu0  ;;  %v5533_v10 = vmul.bf16 %v907_v63, %v5464_v49  ;;  %5148 = vtanh.bf16 %v869_v0 }
 0x131   : > { %v844_v11 = vmul.bf16 1027030327, %v830_v2  ;;  %v774_v12 = vadd.f32 %v4521_v9, %v5444_v25  ;;  %950 = vrot.lane.b32.xlu1 %v5528_v6, %s5249_s28  ;;  %v765_v13 = vpop.f32.mrb[23].mxu0 }
 0x132   : > { %v5143_v14 = vpop.eup %5142  ;;  %v843_v47 = vmul.bf16 1027030327, %v829_v7  ;;  %v766_v15 = vadd.f32 %v5444_v25, %v765_v13  ;;  %948 = vrot.lane.b32.xlu0 %v5533_v10, %s5249_s28 }
 0x133   : > { %v5145_v16 = vpop.eup %5144  ;;  %v5541_v18 = vpack.c.bf16 %v774_v12, %v771_v4  ;;  %v896_v49 = vadd.bf16 1065369472, %v5143_v14  ;;  %v858_v19 = vadd.bf16 %v844_v11, %v5515_v52 }
 0x134   : > { %v5544_v20 = vpack.c.bf16 %v766_v15, %v763_v8  ;;  %v895_v21 = vadd.bf16 1065369472, %v5145_v16  ;;  %v857_v22 = vadd.bf16 %v843_v47, %v5518_v55 }
 0x135   : > { %v818_v24 = vmul.bf16 %v5541_v18, %v5541_v18  ;;  %v910_v26 = vmul.bf16 1056980736, %v896_v49  ;;  %v872_v28 = vmul.bf16 1061961548, %v858_v19 }
 0x136   : > { %v817_v29 = vmul.bf16 %v5544_v20, %v5544_v20  ;;  %v909_v30 = vmul.bf16 1056980736, %v895_v21  ;;  %v4524_v31 = vpop.f32.mrb[24].mxu0  ;;  %v871_v32 = vmul.bf16 1061961548, %v857_v22 }
 0x137   : > { %v832_v33 = vmul.bf16 %v818_v24, %v5541_v18  ;;  %v5553_v36 = vmul.bf16 %v910_v26, %v5476_v1  ;;  %v787_v37 = vadd.f32 %v4524_v31, %v5444_v25  ;;  %v778_v38 = vpop.f32.mrb[25].mxu0  ;;  %5150 = vtanh.bf16 %v872_v28 }
 0x138   : > { %v831_v39 = vmul.bf16 %v817_v29, %v5544_v20  ;;  %v5558_v41 = vmul.bf16 %v909_v30, %v5479_v3  ;;  %v779_v42 = vadd.f32 %v5444_v25, %v778_v38  ;;  %v4525_v43 = vpop.f32.mrb[26].mxu0  ;;  %5152 = vtanh.bf16 %v871_v32 }
 0x139   : > { %v846_v44 = vmul.bf16 1027030327, %v832_v33  ;;  %954 = vrot.lane.b32.xlu0 %v5553_v36, %s5249_s28  ;;  %v790_v1 = vadd.f32 %v4525_v43, %v5444_v25  ;;  %v781_v45 = vpop.f32.mrb[27].mxu0 }
 0x13a   : > { %v5147_v46 = vpop.eup %5146  ;;  %v845_v48 = vmul.bf16 1027030327, %v831_v39  ;;  %952 = vrot.lane.b32.xlu1 %v5558_v41, %s5249_s28  ;;  %v782_v50 = vadd.f32 %v5444_v25, %v781_v45  ;;  %v4693_v45 = vld [vmem:[#allocation2 + $0x14] ss:$8 sps:$4 sm:$0xff]  }
 0x13b   : > { %v5149_v3 = vpop.eup %5148  ;;  %v806_v34 = vpack.c.bf16 %v790_v1, %v787_v37  ;;  %v898_v51 = vadd.bf16 1065369472, %v5147_v46  ;;  %v860_v53 = vadd.bf16 %v846_v44, %v5541_v18  ;;  %v4688_v44 = vld [vmem:[#allocation2] ss:$8 sps:$4 sm:$0xff]   ;;  %v4690_v1 = vld [vmem:[#allocation2 + $0x4] ss:$8 sps:$4 sm:$0xff]  }
 0x13c   : > { %v805_v54 = vpack.c.bf16 %v782_v50, %v779_v42  ;;  %v897_v56 = vadd.bf16 1065369472, %v5149_v3  ;;  %v859_v57 = vadd.bf16 %v845_v48, %v5544_v20  ;;  %1791 = vmatprep.subr.bf16.mxu0 %v4690_v1  ;;  %v4691_v48 = vld [vmem:[#allocation2 + $0x10] ss:$8 sps:$4 sm:$0xff]   ;;  %v4705_v50 = vld [vmem:[#allocation2 + $0x104] ss:$8 sps:$4 sm:$0xff]  }
 0x13d   : > { %v820_v58 = vmul.bf16 %v806_v34, %v806_v34  ;;  %v912_v59 = vmul.bf16 1056980736, %v898_v51  ;;  %v874_v60 = vmul.bf16 1061961548, %v860_v53  ;;  %1792 = vmatpush1.bf16.msra.mxu0 %v4688_v44  ;;  %v4696_v3 = vld [vmem:[#allocation2 + $0x24] ss:$8 sps:$4 sm:$0xff]   ;;  %1588 = vmatprep.subr.bf16.mxu1 %v4705_v50 }
 0x13e   : > { %v819_v61 = vmul.bf16 %v805_v54, %v805_v54  ;;  %v911_v62 = vmul.bf16 1056980736, %v897_v56  ;;  %v873_v63 = vmul.bf16 1061961548, %v859_v57  ;;  %1793 = vmatprep.subr.bf16.mxu0 %v4693_v45  ;;  %v4699_v51 = vld [vmem:[#allocation2 + $0x34] ss:$8 sps:$4 sm:$0xff]  }
 0x13f   : > { %v834_v0 = vmul.bf16 %v820_v58, %v806_v34  ;;  %v5570_v2 = vmul.bf16 %v912_v59, %v5494_v23  ;;  %5154 = vtanh.bf16 %v874_v60  ;;  %v4697_v53 = vld [vmem:[#allocation2 + $0x30] ss:$8 sps:$4 sm:$0xff]   ;;  %v4700_v56 = vld [vmem:[#allocation2 + $0x40] ss:$8 sps:$4 sm:$0xff]   ;;  %v4738_v1 = vld [vmem:[#allocation2 + $0xa4] ss:$8 sps:$4 sm:$0xff]  }
 0x140   : > { %v833_v25 = vmul.bf16 %v819_v61, %v805_v54  ;;  %v5573_v4 = vmul.bf16 %v911_v62, %v5497_v27  ;;  %5156 = vtanh.bf16 %v873_v63  ;;  %v4703_v61 = vld [vmem:[#allocation2 + $0x100] ss:$8 sps:$4 sm:$0xff]   ;;  %v4733_v44 = vld [vmem:[#allocation2 + $0x150] ss:$8 sps:$4 sm:$0xff]  }
 0x141   : > { %v848_v5 = vmul.bf16 1027030327, %v834_v0  ;;  %958 = vrot.lane.b32.xlu0 %v5570_v2, %s5249_s28  ;;  %1794 = vmatpush1.bf16.msra.mxu0 %v4691_v48  ;;  %v4736_v45 = vld [vmem:[#allocation2 + $0xa0] ss:$8 sps:$4 sm:$0xff]   ;;  %v4744_v48 = vld [vmem:[#allocation2 + $0xb4] ss:$8 sps:$4 sm:$0xff]  }
 0x142   : > { %v5151_v7 = vpop.eup %5150  ;;  %v847_v8 = vmul.bf16 1027030327, %v833_v25  ;;  %956 = vrot.lane.b32.xlu1 %v5573_v4, %s5249_s28  ;;  %1795 = vmatprep.subr.bf16.mxu0 %v4696_v3  ;;  %v4742_v50 = vld [vmem:[#allocation2 + $0xb0] ss:$8 sps:$4 sm:$0xff]   ;;  %v4747_v3 = vld [vmem:[#allocation2 + $0x174] ss:$8 sps:$4 sm:$0xff]  }
 0x143   : > { %v5153_v9 = vpop.eup %5152  ;;  %v900_v11 = vadd.bf16 1065369472, %v5151_v7  ;;  %v862_v12 = vadd.bf16 %v848_v5, %v806_v34 }
 0x144   : > { %v899_v23 = vadd.bf16 1065369472, %v5153_v9  ;;  %v861_v13 = vadd.bf16 %v847_v8, %v805_v54 }
 0x145   : > { %v914_v14 = vmul.bf16 1056980736, %v900_v11  ;;  %v876_v47 = vmul.bf16 1061961548, %v862_v12 }
 0x146   : > { %v913_v15 = vmul.bf16 1056980736, %v899_v23  ;;  %v875_v27 = vmul.bf16 1061961548, %v861_v13 }
 0x147   : > { %v5580_v16 = vmul.bf16 %v914_v14, %v5515_v52  ;;  %5158 = vtanh.bf16 %v876_v47 }
 0x148   : > { %v5583_v49 = vmul.bf16 %v913_v15, %v5518_v55  ;;  %5160 = vtanh.bf16 %v875_v27  ;;  %v4708_v15 = vld [vmem:[#allocation2 + $0x54] ss:$8 sps:$4 sm:$0xff]   ;;  %v4706_v27 = vld [vmem:[#allocation2 + $0x50] ss:$8 sps:$4 sm:$0xff]  }
 0x149   : > { %962 = vrot.lane.b32.xlu0 %v5580_v16, %s5249_s28 }
 0x14a   : > { %v5155_v19 = vpop.eup %5154  ;;  %960 = vrot.lane.b32.xlu1 %v5583_v49, %s5249_s28 }
 0x14b   : > { %v5157_v21 = vpop.eup %5156  ;;  %v902_v22 = vadd.bf16 1065369472, %v5155_v19  ;;  %v4709_v19 = vld [vmem:[#allocation2 + $0x110] ss:$8 sps:$4 sm:$0xff]  }
 0x14c   : > { %v901_v24 = vadd.bf16 1065369472, %v5157_v21  ;;  %v4714_v21 = vld [vmem:[#allocation2 + $0x64] ss:$8 sps:$4 sm:$0xff]  }
 0x14d   : > { %v916_v26 = vmul.bf16 1056980736, %v902_v22  ;;  %v4712_v22 = vld [vmem:[#allocation2 + $0x60] ss:$8 sps:$4 sm:$0xff]  }
 0x14e   : > { %v915_v28 = vmul.bf16 1056980736, %v901_v24  ;;  %v4717_v24 = vld [vmem:[#allocation2 + $0x124] ss:$8 sps:$4 sm:$0xff]  }
 0x14f   : > { %v5590_v52 = vmul.bf16 %v916_v26, %v5541_v18  ;;  %v807_v18 = vmul.bf16 %v5452_v35, %v5452_v35  ;;  %v4715_v26 = vld [vmem:[#allocation2 + $0x120] ss:$8 sps:$4 sm:$0xff]  }
 0x150   : > { %v5593_v29 = vmul.bf16 %v915_v28, %v5544_v20 }
 0x151   : > { %966 = vrot.lane.b32.xlu0 %v5590_v52, %s5249_s28  ;;  %v821_v20 = vmul.bf16 %v807_v18, %v5452_v35  ;;  %v4727_v18 = vld [vmem:[#allocation2 + $0x140] ss:$8 sps:$4 sm:$0xff]  }
 0x152   : > { %v5159_v55 = vpop.eup %5158  ;;  %964 = vrot.lane.b32.xlu1 %v5593_v29, %s5249_s28 }
 0x153   : > { %v5161_v30 = vpop.eup %5160  ;;  %v904_v31 = vadd.bf16 1065369472, %v5159_v55  ;;  %v835_v42 = vmul.bf16 1027030327, %v821_v20  ;;  %v4718_v55 = vld [vmem:[#allocation2 + $0x70] ss:$8 sps:$4 sm:$0xff]  }
 0x154   : > { %v903_v32 = vadd.bf16 1065369472, %v5161_v30  ;;  %v4723_v30 = vld [vmem:[#allocation2 + $0x134] ss:$8 sps:$4 sm:$0xff]  }
 0x155   : > { %v918_v33 = vmul.bf16 1056980736, %v904_v31  ;;  %v849_v43 = vadd.bf16 %v835_v42, %v5452_v35  ;;  %v4732_v20 = vld [vmem:[#allocation2 + $0x94] ss:$8 sps:$4 sm:$0xff]   ;;  %v4730_v42 = vld [vmem:[#allocation2 + $0x90] ss:$8 sps:$4 sm:$0xff]  }
 0x156   : > { %v917_v37 = vmul.bf16 1056980736, %v903_v32  ;;  %v4721_v32 = vld [vmem:[#allocation2 + $0x130] ss:$8 sps:$4 sm:$0xff]  }
 0x157   : > { %v932_v38 = vmul.bf16 %v918_v33, %v806_v34  ;;  %v863_v46 = vmul.bf16 1061961548, %v849_v43  ;;  %v4694_v34 = vld [vmem:[#allocation2 + $0x20] ss:$8 sps:$4 sm:$0xff]   ;;  %v4726_v33 = vld [vmem:[#allocation2 + $0x84] ss:$8 sps:$4 sm:$0xff]  }
 0x158   : > { %v5599_v39 = vmul.bf16 %v917_v37, %v805_v54  ;;  %1796 = vmatpush1.bf16.msra.mxu0 %v4694_v34  ;;  %v4702_v54 = vld [vmem:[#allocation2 + $0x44] ss:$8 sps:$4 sm:$0xff]   ;;  %v4735_v43 = vld [vmem:[#allocation2 + $0x154] ss:$8 sps:$4 sm:$0xff]   ;;  %v4745_v34 = vld [vmem:[#allocation2 + $0x170] ss:$8 sps:$4 sm:$0xff]  }
 0x159   : > { %970 = vrot.lane.b32.xlu0 %v932_v38, %s5249_s28  ;;  %5162 = vtanh.bf16 %v863_v46  ;;  %1797 = vmatprep.subr.bf16.mxu0 %v4699_v51  ;;  %v4729_v38 = vld [vmem:[#allocation2 + $0x144] ss:$8 sps:$4 sm:$0xff]   ;;  %v4739_v46 = vld [vmem:[#allocation2 + $0x160] ss:$8 sps:$4 sm:$0xff]  }
 0x15a   : > { %968 = vrot.lane.b32.xlu1 %v5599_v39, %s5249_s28  ;;  %v4750_v51 = vld [vmem:[#allocation2 + $0xc4] ss:$8 sps:$4 sm:$0xff]  }
 0x15c   : > { %1798 = vmatpush1.bf16.msra.mxu0 %v4697_v53  ;;  %v4748_v53 = vld [vmem:[#allocation2 + $0xc0] ss:$8 sps:$4 sm:$0xff]  }
 0x15d   : > { %1799 = vmatprep.subr.bf16.mxu0 %v4702_v54  ;;  %v4753_v54 = vld [vmem:[#allocation2 + $0x184] ss:$8 sps:$4 sm:$0xff]  }
 0x160   : > { %1800 = vmatpush1.bf16.msra.mxu0 %v4700_v56  ;;  %v4751_v56 = vld [vmem:[#allocation2 + $0x180] ss:$8 sps:$4 sm:$0xff]  }
 0x161   : > { %1801 = vmatprep.subr.bf16.mxu0 %v4708_v15 }
 0x164   : > { %v5163_v57 = vpop.eup %5162  ;;  %1802 = vmatpush1.bf16.msra.mxu0 %v4706_v27 }
 0x165   : > { %v891_v58 = vadd.bf16 1065369472, %v5163_v57  ;;  %1803 = vmatprep.subr.bf16.mxu0 %v4714_v21  ;;  %v4756_v57 = vld [vmem:[#allocation2 + $0xd4] ss:$8 sps:$4 sm:$0xff]  }
 0x167   : > { %v905_v59 = vmul.bf16 1056980736, %v891_v58  ;;  %v4754_v58 = vld [vmem:[#allocation2 + $0xd0] ss:$8 sps:$4 sm:$0xff]  }
 0x168   : > { %1804 = vmatpush1.bf16.msra.mxu0 %v4712_v22 }
 0x169   : > { %v919_v60 = vmul.bf16 %v905_v59, %v5452_v35  ;;  %v4759_v59 = vld [vmem:[#allocation2 + $0x194] ss:$8 sps:$4 sm:$0xff]  }
 0x19b   : > { %v947_v62 = vpop.permute.xlu0 %946 }
 0x19c   : > { %v975_v63 = vsel %vm972_vm3, %v919_v60, %v947_v62  ;;  %v4757_v60 = vld [vmem:[#allocation2 + $0x190] ss:$8 sps:$4 sm:$0xff]   ;;  %v4760_v62 = vld [vmem:[#allocation2 + $0xe0] ss:$8 sps:$4 sm:$0xff]  }
 0x19d   : > { %4543 = vmatmul.mubr.bf16.vlgmr.msra.gmra.mrb[0].mxu1 %v975_v63  ;;  %v4765_v63 = vld [vmem:[#allocation2 + $0x1a4] ss:$8 sps:$4 sm:$0xff]  }
 0x19e   : > { %4546 = vmatprep.mubr.msk.bf16.mxu1 %vm5248_vm2, %v5247_v17  ;;  %1589 = vmatpush1.bf16.msra.mxu1 %v4703_v61  ;;  %v4762_v61 = vld [vmem:[#allocation2 + $0xe4] ss:$8 sps:$4 sm:$0xff]  }
 0x1a3   : > { %v951_v5 = vpop.permute.xlu1 %950 }
 0x1a4   : > { %v949_v0 = vpop.permute.xlu0 %948  ;;  %v983_v35 = vsel %vm972_vm3, %v5533_v10, %v951_v5  ;;  %v4766_v5 = vld [vmem:[#allocation2 + $0xf0] ss:$8 sps:$4 sm:$0xff]  }
 0x1a5   : > { %v979_v25 = vsel %vm972_vm3, %v5507_v40, %v949_v0  ;;  %v4763_v0 = vld [vmem:[#allocation2 + $0x1a0] ss:$8 sps:$4 sm:$0xff]  }
 0x1a6   : > { %4547 = vmatmul.mubr.bf16.gmra.mrb[4].mxu1 %v979_v25  ;;  %v4768_v25 = vld [vmem:[#allocation2 + $0xf4] ss:$8 sps:$4 sm:$0xff]  }
 0x1a7   : > { %4550 = vmatprep.mubr.msk.bf16.mxu1 %vm5248_vm2, %v5247_v17 }
 0x1ab   : > { %v955_v40 = vpop.permute.xlu0 %954 }
 0x1ac   : > { %v953_v7 = vpop.permute.xlu1 %952  ;;  %v991_v9 = vsel %vm972_vm3, %v5558_v41, %v955_v40  ;;  %v4777_v40 = vld [vmem:[#allocation2 + $0x1c4] ss:$8 sps:$4 sm:$0xff]  }
 0x1ad   : > { %v987_v8 = vsel %vm972_vm3, %v5528_v6, %v953_v7  ;;  %v4769_v7 = vld [vmem:[#allocation2 + $0x1b0] ss:$8 sps:$4 sm:$0xff]  }
 0x1ae   : > { %4551 = vmatmul.mubr.bf16.gmra.mrb[8].mxu1 %v983_v35  ;;  %v4771_v35 = vld [vmem:[#allocation2 + $0x1b4] ss:$8 sps:$4 sm:$0xff]  }
 0x1af   : > { %4554 = vmatprep.mubr.msk.bf16.mxu1 %vm5248_vm2, %v5247_v17 }
 0x1b3   : > { %v959_v6 = vpop.permute.xlu0 %958 }
 0x1b4   : > { %v957_v10 = vpop.permute.xlu1 %956  ;;  %v999_v12 = vsel %vm972_vm3, %v5573_v4, %v959_v6  ;;  %v4789_v6 = vld [vmem:[#allocation2 + $0x1e4] ss:$8 sps:$4 sm:$0xff]  }
 0x1b5   : > { %v995_v11 = vsel %vm972_vm3, %v5553_v36, %v957_v10  ;;  %v4783_v10 = vld [vmem:[#allocation2 + $0x1d4] ss:$8 sps:$4 sm:$0xff]  }
 0x1b6   : > { %4555 = vmatmul.mubr.bf16.gmra.mrb[12].mxu1 %v987_v8  ;;  %v4774_v8 = vld [vmem:[#allocation2 + $0x204] ss:$8 sps:$4 sm:$0xff]  }
 0x1b7   : > { %4558 = vmatprep.mubr.msk.bf16.mxu1 %vm5248_vm2, %v5247_v17 }
 0x1bb   : > { %v963_v36 = vpop.permute.xlu0 %962 }
 0x1bc   : > { %v961_v41 = vpop.permute.xlu1 %960  ;;  %v1007_v13 = vsel %vm972_vm3, %v5583_v49, %v963_v36  ;;  %v4711_v49 = vld [vmem:[#allocation2 + $0x114] ss:$8 sps:$4 sm:$0xff]   ;;  %v5661_v36 = vld [vmem:[%s6202_s4] ss:$0 sm:$0xff] }
 0x1bd   : > { %v1003_v23 = vsel %vm972_vm3, %v5570_v2, %v961_v41  ;;  %1590 = vmatprep.subr.bf16.mxu1 %v4711_v49  ;;  %v4795_v41 = vld [vmem:[#allocation2 + $0x1f4] ss:$8 sps:$4 sm:$0xff]  }
 0x1be   : > { %4559 = vmatmul.mubr.bf16.gmra.mrb[16].mxu1 %v991_v9  ;;  %v4775_v9 = vld [vmem:[#allocation2 + $0x1c0] ss:$8 sps:$4 sm:$0xff]  }
 0x1bf   : > { %4562 = vmatprep.mubr.msk.bf16.mxu1 %vm5248_vm2, %v5247_v17  ;;  %1591 = vmatpush1.bf16.msra.mxu1 %v4709_v19 }
 0x1c0   : > { %1592 = vmatprep.subr.bf16.mxu1 %v4717_v24 }
 0x1c3   : > { %v967_v2 = vpop.permute.xlu0 %966  ;;  %1593 = vmatpush1.bf16.msra.mxu1 %v4715_v26 }
 0x1c4   : > { %v965_v4 = vpop.permute.xlu1 %964  ;;  %v1015_v47 = vsel %vm972_vm3, %v5593_v29, %v967_v2  ;;  %v4720_v29 = vld [vmem:[#allocation2 + $0x74] ss:$8 sps:$4 sm:$0xff]   ;;  %1594 = vmatprep.subr.bf16.mxu1 %v4723_v30 }
 0x1c5   : > { %v1011_v14 = vsel %vm972_vm3, %v5580_v16, %v965_v4  ;;  %1805 = vmatprep.subr.bf16.mxu0 %v4720_v29 }
 0x1c6   : > { %4563 = vmatmul.mubr.bf16.gmra.mrb[20].mxu1 %v995_v11  ;;  %1806 = vmatpush1.bf16.msra.mxu0 %v4718_v55  ;;  %v4781_v11 = vld [vmem:[#allocation2 + $0x1d0] ss:$8 sps:$4 sm:$0xff]  }
 0x1c7   : > { %4566 = vmatprep.mubr.msk.bf16.mxu1 %vm5248_vm2, %v5247_v17  ;;  %1595 = vmatpush1.bf16.msra.mxu1 %v4721_v32 }
 0x1c8   : > { %1807 = vmatprep.subr.bf16.mxu0 %v4726_v33  ;;  %1596 = vmatprep.subr.bf16.mxu1 %v4729_v38 }
 0x1cb   : > { %v971_v31 = vpop.permute.xlu0 %970  ;;  %1597 = vmatpush1.bf16.msra.mxu1 %v4727_v18 }
 0x1cc   : > { %v969_v16 = vpop.permute.xlu1 %968  ;;  %v1023_v37 = vsel %vm972_vm3, %v5599_v39, %v971_v31  ;;  %1598 = vmatprep.subr.bf16.mxu1 %v4735_v43  ;;  %v4741_v39 = vld [vmem:[#allocation2 + $0x164] ss:$8 sps:$4 sm:$0xff]  }
 0x1cd   : > { %v1019_v28 = vsel %vm972_vm3, %v5590_v52, %v969_v16  ;;  %v4724_v52 = vld [vmem:[#allocation2 + $0x80] ss:$8 sps:$4 sm:$0xff]  }
 0x1ce   : > { %4567 = vmatmul.mubr.bf16.gmra.mrb[24].mxu1 %v999_v12  ;;  %1808 = vmatpush1.bf16.msra.mxu0 %v4724_v52  ;;  %v4787_v12 = vld [vmem:[#allocation2 + $0x1e0] ss:$8 sps:$4 sm:$0xff]  }
 0x1cf   : > { %4570 = vmatprep.mubr.msk.bf16.mxu1 %vm5248_vm2, %v5247_v17  ;;  %1809 = vmatprep.subr.bf16.mxu0 %v4732_v20 }
 0x1d0   : > { %1599 = vmatpush1.bf16.msra.mxu1 %v4733_v44 }
 0x1d1   : > { %1600 = vmatprep.subr.bf16.mxu1 %v4741_v39 }
 0x1d2   : > { %1810 = vmatpush1.bf16.msra.mxu0 %v4730_v42 }
 0x1d3   : > { %1811 = vmatprep.subr.bf16.mxu0 %v4738_v1 }
 0x1d4   : > { %1601 = vmatpush1.bf16.msra.mxu1 %v4739_v46 }
 0x1d5   : > { %1602 = vmatprep.subr.bf16.mxu1 %v4747_v3 }
 0x1d6   : > { %4571 = vmatmul.mubr.bf16.gmra.mrb[28].mxu1 %v1003_v23  ;;  %1812 = vmatpush1.bf16.msra.mxu0 %v4736_v45  ;;  %v4793_v23 = vld [vmem:[#allocation2 + $0x1f0] ss:$8 sps:$4 sm:$0xff]  }
 0x1d7   : > { %4574 = vmatprep.mubr.msk.bf16.mxu1 %vm5248_vm2, %v5247_v17  ;;  %1813 = vmatprep.subr.bf16.mxu0 %v4744_v48 }
 0x1d8   : > { %1603 = vmatpush1.bf16.msra.mxu1 %v4745_v34 }
 0x1d9   : > { %1604 = vmatprep.subr.bf16.mxu1 %v4753_v54 }
 0x1da   : > { %1814 = vmatpush1.bf16.msra.mxu0 %v4742_v50 }
 0x1db   : > { %1815 = vmatprep.subr.bf16.mxu0 %v4750_v51 }
 0x1dc   : > { %1605 = vmatpush1.bf16.msra.mxu1 %v4751_v56 }
 0x1dd   : > { %1606 = vmatprep.subr.bf16.mxu1 %v4759_v59 }
 0x1de   : > { %4575 = vmatmul.mubr.bf16.gmra.mrb[32].mxu1 %v1007_v13  ;;  %1816 = vmatpush1.bf16.msra.mxu0 %v4748_v53 }
 0x1df   : > { %4578 = vmatprep.mubr.msk.bf16.mxu1 %vm5248_vm2, %v5247_v17  ;;  %1817 = vmatprep.subr.bf16.mxu0 %v4756_v57 }
 0x1e0   : > { %1607 = vmatpush1.bf16.msra.mxu1 %v4757_v60 }
 0x1e1   : > { %1608 = vmatprep.subr.bf16.mxu1 %v4765_v63 }
 0x1e2   : > { %1818 = vmatpush1.bf16.msra.mxu0 %v4754_v58 }
 0x1e3   : > { %1819 = vmatprep.subr.bf16.mxu0 %v4762_v61 }
 0x1e4   : > { %1609 = vmatpush1.bf16.msra.mxu1 %v4763_v0 }
 0x1e5   : > { %1610 = vmatprep.subr.bf16.mxu1 %v4771_v35 }
 0x1e6   : > { %4579 = vmatmul.mubr.bf16.gmra.mrb[36].mxu1 %v1011_v14  ;;  %1820 = vmatpush1.bf16.msra.mxu0 %v4760_v62 }
 0x1e7   : > { %4582 = vmatprep.mubr.msk.bf16.mxu1 %vm5248_vm2, %v5247_v17  ;;  %1821 = vmatprep.subr.bf16.mxu0 %v4768_v25 }
 0x1e8   : > { %1611 = vmatpush1.bf16.msra.mxu1 %v4769_v7 }
 0x1e9   : > { %1612 = vmatprep.subr.bf16.mxu1 %v4777_v40 }
 0x1ea   : > { %1822 = vmatpush1.bf16.msra.mxu0 %v4766_v5 }
 0x1eb   : > { %2027 = vmatprep.subr.bf16.mxu0 %v4774_v8 }
 0x1ec   : > { %1613 = vmatpush1.bf16.msra.mxu1 %v4775_v9 }
 0x1ed   : > { %1614 = vmatprep.subr.bf16.mxu1 %v4783_v10 }
 0x1ee   : > { %4583 = vmatmul.mubr.bf16.gmra.mrb[40].mxu1 %v1015_v47 }
 0x1ef   : > { %4586 = vmatprep.mubr.msk.bf16.mxu1 %vm5248_vm2, %v5247_v17 }
 0x1f0   : > { %1615 = vmatpush1.bf16.msra.mxu1 %v4781_v11 }
 0x1f1   : > { %1616 = vmatprep.subr.bf16.mxu1 %v4789_v6 }
 0x1f4   : > { %1617 = vmatpush1.bf16.msra.mxu1 %v4787_v12 }
 0x1f5   : > { %1618 = vmatprep.subr.bf16.mxu1 %v4795_v41 }
 0x1f6   : > { %4587 = vmatmul.mubr.bf16.gmra.mrb[44].mxu1 %v1019_v28 }
 0x1f7   : > { %4590 = vmatprep.mubr.msk.bf16.mxu1 %vm5248_vm2, %v5247_v17 }
 0x1f8   : > { %1619 = vmatpush1.bf16.msra.mxu1 %v4793_v23 }
 0x1fe   : > { %4591 = vmatmul.mubr.bf16.gmra.mrb[48].mxu1 %v1023_v37 }
 0x270   : > { %v1130_v13 = vpop.f32.mrb[0].mxu1 }
 0x271   : > { %v4544_v4 = vpop.f32.mrb[1].mxu1  ;;  %v1131_v2 = vadd.f32 %v5661_v36, %v1130_v13 }
 0x272   : > { %v1133_v14 = vpop.f32.mrb[2].mxu1 }
 0x273   : > { %v1134_v47 = vadd.f32 %v5661_v36, %v1133_v14  ;;  %v4545_v15 = vpop.f32.mrb[3].mxu1  ;;  %v4772_v14 = vld [vmem:[#allocation2 + $0x200] ss:$8 sps:$4 sm:$0xff]  }
 0x274   : > { %v4780_v15 = vld [vmem:[#allocation2 + $0x214] ss:$8 sps:$4 sm:$0xff]  }
 0x275   : > { %v5665_v27 = vpack.c.bf16 %v1134_v47, %v1131_v2 }
 0x277   : > { %v1246_v49 = vmul.bf16 %v5665_v27, %v5665_v27 }
 0x279   : > { %v1259_v19 = vmul.bf16 %v1246_v49, %v5665_v27  ;;  %v1138_v16 = vpop.f32.mrb[4].mxu1 }
 0x27a   : > { %v4548_v21 = vpop.f32.mrb[5].mxu1  ;;  %v1139_v26 = vadd.f32 %v5661_v36, %v1138_v16 }
 0x27b   : > { %v1272_v22 = vmul.bf16 1027030327, %v1259_v19  ;;  %v1141_v24 = vpop.f32.mrb[6].mxu1 }
 0x27c   : > { %v1142_v28 = vadd.f32 %v5661_v36, %v1141_v24  ;;  %v4549_v29 = vpop.f32.mrb[7].mxu1  ;;  %v4786_v24 = vld [vmem:[#allocation2 + $0x224] ss:$8 sps:$4 sm:$0xff]  }
 0x27d   : > { %v1285_v55 = vadd.bf16 %v1272_v22, %v5665_v27  ;;  %v4778_v22 = vld [vmem:[#allocation2 + $0x210] ss:$8 sps:$4 sm:$0xff]  }
 0x27e   : > { %v1234_v30 = vpack.c.bf16 %v1142_v28, %v1139_v26 }
 0x27f   : > { %v1298_v32 = vmul.bf16 1061961548, %v1285_v55 }
 0x280   : > { %v1247_v31 = vmul.bf16 %v1234_v30, %v1234_v30 }
 0x281   : > { %v1146_v33 = vpop.f32.mrb[8].mxu1  ;;  %5164 = vtanh.bf16 %v1298_v32 }
 0x282   : > { %v1260_v37 = vmul.bf16 %v1247_v31, %v1234_v30  ;;  %v4552_v52 = vpop.f32.mrb[9].mxu1  ;;  %v1147_v20 = vadd.f32 %v5661_v36, %v1146_v33  ;;  %v4792_v33 = vld [vmem:[#allocation2 + $0x234] ss:$8 sps:$4 sm:$0xff]  }
 0x283   : > { %v1149_v38 = vpop.f32.mrb[10].mxu1 }
 0x284   : > { %v1273_v18 = vmul.bf16 1027030327, %v1260_v37  ;;  %v1150_v42 = vadd.f32 %v5661_v36, %v1149_v38  ;;  %v4553_v43 = vpop.f32.mrb[11].mxu1 }
 0x285   : > { %v4790_v43 = vld [vmem:[#allocation2 + $0x230] ss:$8 sps:$4 sm:$0xff]  }
 0x286   : > { %v5675_v44 = vpack.c.bf16 %v1150_v42, %v1147_v20  ;;  %v1286_v1 = vadd.bf16 %v1273_v18, %v1234_v30 }
 0x288   : > { %v1248_v45 = vmul.bf16 %v5675_v44, %v5675_v44  ;;  %v1299_v39 = vmul.bf16 1061961548, %v1286_v1 }
 0x289   : > { %v1154_v46 = vpop.f32.mrb[12].mxu1 }
 0x28a   : > { %v1261_v48 = vmul.bf16 %v1248_v45, %v5675_v44  ;;  %v4556_v50 = vpop.f32.mrb[13].mxu1  ;;  %5166 = vtanh.bf16 %v1299_v39  ;;  %v1155_v51 = vadd.f32 %v5661_v36, %v1154_v46  ;;  %v4798_v46 = vld [vmem:[#allocation2 + $0x244] ss:$8 sps:$4 sm:$0xff]  }
 0x28b   : > { %v1157_v3 = vpop.f32.mrb[14].mxu1 }
 0x28c   : > { %v1274_v34 = vmul.bf16 1027030327, %v1261_v48  ;;  %v1158_v53 = vadd.f32 %v5661_v36, %v1157_v3  ;;  %v4557_v54 = vpop.f32.mrb[15].mxu1  ;;  %v5165_v58 = vpop.eup %5164 }
 0x28d   : > { %v1324_v0 = vadd.bf16 1065369472, %v5165_v58  ;;  %v4801_v58 = vld [vmem:[#allocation2 + $0x254] ss:$8 sps:$4 sm:$0xff]  }
 0x28e   : > { %v1287_v56 = vadd.bf16 %v1274_v34, %v5675_v44  ;;  %v5683_v57 = vpack.c.bf16 %v1158_v53, %v1155_v51  ;;  %v4796_v53 = vld [vmem:[#allocation2 + $0x240] ss:$8 sps:$4 sm:$0xff]  }
 0x28f   : > { %v1337_v6 = vmul.bf16 1056980736, %v1324_v0 }
 0x290   : > { %v1249_v59 = vmul.bf16 %v5683_v57, %v5683_v57  ;;  %v1300_v60 = vmul.bf16 1061961548, %v1287_v56 }
 0x291   : > { %v1162_v61 = vpop.f32.mrb[16].mxu1  ;;  %v1350_v2 = vmul.bf16 %v1337_v6, %v5665_v27 }
 0x292   : > { %v1262_v62 = vmul.bf16 %v1249_v59, %v5683_v57  ;;  %v4560_v63 = vpop.f32.mrb[17].mxu1  ;;  %v1163_v35 = vadd.f32 %v5661_v36, %v1162_v61  ;;  %5168 = vtanh.bf16 %v1300_v60 }
 0x293   : > { %v1165_v25 = vpop.f32.mrb[18].mxu1  ;;  %v4799_v63 = vld [vmem:[#allocation2 + $0x250] ss:$8 sps:$4 sm:$0xff]  }
 0x294   : > { %v1275_v5 = vmul.bf16 1027030327, %v1262_v62  ;;  %v1166_v7 = vadd.f32 %v5661_v36, %v1165_v25  ;;  %v4561_v8 = vpop.f32.mrb[19].mxu1 }
 0x295   : > { %v5167_v40 = vpop.eup %5166  ;;  %v4807_v8 = vld [vmem:[#allocation2 + $0x274] ss:$8 sps:$4 sm:$0xff]  }
 0x296   : > { %v5690_v9 = vpack.c.bf16 %v1166_v7, %v1163_v35  ;;  %v1325_v10 = vadd.bf16 1065369472, %v5167_v40  ;;  %v1288_v11 = vadd.bf16 %v1275_v5, %v5683_v57  ;;  %v4802_v35 = vld [vmem:[#allocation2 + $0x260] ss:$8 sps:$4 sm:$0xff]  }
 0x298   : > { %v1338_v12 = vmul.bf16 1056980736, %v1325_v10  ;;  %v1301_v41 = vmul.bf16 1061961548, %v1288_v11  ;;  %v1250_v0 = vmul.bf16 %v5690_v9, %v5690_v9 }
 0x299   : > { %v1170_v23 = vpop.f32.mrb[20].mxu1 }
 0x29a   : > { %v4564_v13 = vpop.f32.mrb[21].mxu1  ;;  %v1351_v4 = vmul.bf16 %v1338_v12, %v1234_v30  ;;  %5170 = vtanh.bf16 %v1301_v41  ;;  %v1171_v49 = vadd.f32 %v5661_v36, %v1170_v23  ;;  %v4784_v30 = vld [vmem:[#allocation2 + $0x220] ss:$8 sps:$4 sm:$0xff]   ;;  %v1263_v12 = vmul.bf16 %v1250_v0, %v5690_v9 }
 0x29b   : > { %v1173_v47 = vpop.f32.mrb[22].mxu1  ;;  %v4805_v13 = vld [vmem:[#allocation2 + $0x270] ss:$8 sps:$4 sm:$0xff]  }
 0x29c   : > { %v1174_v19 = vadd.f32 %v5661_v36, %v1173_v47  ;;  %v4565_v16 = vpop.f32.mrb[23].mxu1  ;;  %1823 = vmatprep.mubr.bf16.mxu0 %v1351_v4  ;;  %v1276_v47 = vmul.bf16 1027030327, %v1263_v12 }
 0x29d   : > { %1824 = vmatmul.mubr.bf16.vlgmr.msra.gmra.mrb[28].mxu0 %v1350_v2  ;;  %v5169_v26 = vpop.eup %5168  ;;  %v4808_v16 = vld [vmem:[#allocation2 + $0x280] ss:$8 sps:$4 sm:$0xff]  }
 0x29e   : > { %v5696_v21 = vpack.c.bf16 %v1174_v19, %v1171_v49  ;;  %2028 = vmatpush1.bf16.msra.mxu0 %v4772_v14  ;;  %v1326_v31 = vadd.bf16 1065369472, %v5169_v26  ;;  %v4810_v14 = vld [vmem:[#allocation2 + $0x284] ss:$8 sps:$4 sm:$0xff]   ;;  %v4813_v26 = vld [vmem:[#allocation2 + $0x294] ss:$8 sps:$4 sm:$0xff]  }
 0x29f   : > { %2029 = vmatprep.subr.bf16.mxu0 %v4780_v15 }
 0x2a0   : > { %v1251_v28 = vmul.bf16 %v5696_v21, %v5696_v21  ;;  %v1339_v39 = vmul.bf16 1056980736, %v1326_v31  ;;  %v4811_v31 = vld [vmem:[#allocation2 + $0x290] ss:$8 sps:$4 sm:$0xff]  }
 0x2a1   : > { %v1178_v27 = vpop.f32.mrb[24].mxu1 }
 0x2a2   : > { %v1264_v29 = vmul.bf16 %v1251_v28, %v5696_v21  ;;  %2030 = vmatpush1.bf16.msra.mxu0 %v4778_v22  ;;  %v4568_v55 = vpop.f32.mrb[25].mxu1  ;;  %v1179_v52 = vadd.f32 %v5661_v36, %v1178_v27  ;;  %v1352_v54 = vmul.bf16 %v1339_v39, %v5675_v44 }
 0x2a3   : > { %v1181_v32 = vpop.f32.mrb[26].mxu1  ;;  %2031 = vmatprep.subr.bf16.mxu0 %v4786_v24  ;;  %v1289_v55 = vadd.bf16 %v1276_v47, %v5690_v9 }
 0x2a4   : > { %v1277_v37 = vmul.bf16 1027030327, %v1264_v29  ;;  %v1182_v38 = vadd.f32 %v5661_v36, %v1181_v32  ;;  %v4569_v18 = vpop.f32.mrb[27].mxu1 }
 0x2a5   : > { %v5171_v20 = vpop.eup %5170 }
 0x2a6   : > { %v5703_v42 = vpack.c.bf16 %v1182_v38, %v1179_v52  ;;  %2032 = vmatpush1.bf16.msra.mxu0 %v4784_v30  ;;  %v1327_v1 = vadd.bf16 1065369472, %v5171_v20  ;;  %v1290_v45 = vadd.bf16 %v1277_v37, %v5696_v21  ;;  %v4814_v38 = vld [vmem:[#allocation2 + $0x2a0] ss:$8 sps:$4 sm:$0xff]  }
 0x2a7   : > { %2033 = vmatprep.subr.bf16.mxu0 %v4792_v33  ;;  %v4816_v33 = vld [vmem:[#allocation2 + $0x2a4] ss:$8 sps:$4 sm:$0xff]  }
 0x2a8   : > { %v1340_v48 = vmul.bf16 1056980736, %v1327_v1  ;;  %v1303_v50 = vmul.bf16 1061961548, %v1290_v45 }
 0x2a9   : > { %v1186_v3 = vpop.f32.mrb[28].mxu1 }
 0x2aa   : > { %2034 = vmatpush1.bf16.msra.mxu0 %v4790_v43  ;;  %v4572_v34 = vpop.f32.mrb[29].mxu1  ;;  %v1353_v51 = vmul.bf16 %v1340_v48, %v5683_v57  ;;  %5172 = vtanh.bf16 %v1303_v50  ;;  %v1187_v59 = vadd.f32 %v5661_v36, %v1186_v3  ;;  %v4804_v57 = vld [vmem:[#allocation2 + $0x264] ss:$8 sps:$4 sm:$0xff]   ;;  %v4819_v43 = vld [vmem:[#allocation2 + $0x2b4] ss:$8 sps:$4 sm:$0xff]  }
 0x2ab   : > { %v1189_v56 = vpop.f32.mrb[30].mxu1  ;;  %2035 = vmatprep.subr.bf16.mxu0 %v4798_v46  ;;  %v4817_v48 = vld [vmem:[#allocation2 + $0x2b0] ss:$8 sps:$4 sm:$0xff]   ;;  %v4822_v50 = vld [vmem:[#allocation2 + $0x2c4] ss:$8 sps:$4 sm:$0xff]  }
 0x2ac   : > { %v1190_v60 = vadd.f32 %v5661_v36, %v1189_v56  ;;  %v4573_v61 = vpop.f32.mrb[31].mxu1  ;;  %1620 = vmatprep.mubr.bf16.mxu1 %v1353_v51  ;;  %v4820_v51 = vld [vmem:[#allocation2 + $0x2c0] ss:$8 sps:$4 sm:$0xff]  }
 0x2ad   : > { %1621 = vmatmul.mubr.bf16.vlgmr.msra.gmra.mrb[52].mxu1 %v1352_v54  ;;  %v4825_v54 = vld [vmem:[#allocation2 + $0x2d4] ss:$8 sps:$4 sm:$0xff]   ;;  %v4823_v61 = vld [vmem:[#allocation2 + $0x2d0] ss:$8 sps:$4 sm:$0xff]  }
 0x2ae   : > { %v5710_v62 = vpack.c.bf16 %v1190_v60, %v1187_v59  ;;  %2036 = vmatpush1.bf16.msra.mxu0 %v4796_v53 }
 0x2af   : > { %2037 = vmatprep.subr.bf16.mxu0 %v4801_v58 }
 0x2b0   : > { %v1253_v25 = vmul.bf16 %v5710_v62, %v5710_v62 }
 0x2b1   : > { %v1194_v44 = vpop.f32.mrb[32].mxu1 }
 0x2b2   : > { %2038 = vmatpush1.bf16.msra.mxu0 %v4799_v63  ;;  %v4576_v5 = vpop.f32.mrb[33].mxu1  ;;  %v1195_v40 = vadd.f32 %v5661_v36, %v1194_v44  ;;  %v1266_v41 = vmul.bf16 %v1253_v25, %v5710_v62  ;;  %v4828_v63 = vld [vmem:[#allocation2 + $0x2e4] ss:$8 sps:$4 sm:$0xff]  }
 0x2b3   : > { %v1197_v7 = vpop.f32.mrb[34].mxu1  ;;  %2039 = vmatprep.subr.bf16.mxu0 %v4804_v57 }
 0x2b4   : > { %v1198_v10 = vadd.f32 %v5661_v36, %v1197_v7  ;;  %v4577_v11 = vpop.f32.mrb[35].mxu1  ;;  %v1279_v49 = vmul.bf16 1027030327, %v1266_v41  ;;  %v4829_v41 = vld [vmem:[#allocation2 + $0x2f0] ss:$8 sps:$4 sm:$0xff]  }
 0x2b5   : > { %v5173_v6 = vpop.eup %5172 }
 0x2b6   : > { %v5720_v23 = vpack.c.bf16 %v1198_v10, %v1195_v40  ;;  %2040 = vmatpush1.bf16.msra.mxu0 %v4802_v35  ;;  %v1329_v4 = vadd.bf16 1065369472, %v5173_v6  ;;  %v1292_v32 = vadd.bf16 %v1279_v49, %v5710_v62  ;;  %v4826_v35 = vld [vmem:[#allocation2 + $0x2e0] ss:$8 sps:$4 sm:$0xff]  }
 0x2b7   : > { %2041 = vmatprep.subr.bf16.mxu0 %v4807_v8  ;;  %v4831_v8 = vld [vmem:[#allocation2 + $0x2f4] ss:$8 sps:$4 sm:$0xff]  }
 0x2b8   : > { %v1342_v2 = vmul.bf16 1056980736, %v1329_v4  ;;  %v1305_v18 = vmul.bf16 1061961548, %v1292_v32  ;;  %v4834_v4 = vld [vmem:[#allocation2 + $0x304] ss:$8 sps:$4 sm:$0xff]  }
 0x2b9   : > { %v1202_v15 = vpop.f32.mrb[36].mxu1  ;;  %v4855_v32 = vld [vmem:[#allocation2 + $0x374] ss:$8 sps:$4 sm:$0xff]  }
 0x2ba   : > { %2042 = vmatpush1.bf16.msra.mxu0 %v4805_v13  ;;  %v4580_v19 = vpop.f32.mrb[37].mxu1  ;;  %v1355_v22 = vmul.bf16 %v1342_v2, %v5696_v21  ;;  %v1203_v28 = vadd.f32 %v5661_v36, %v1202_v15  ;;  %v1302_v21 = vmul.bf16 1061961548, %v1289_v55  ;;  %v4832_v2 = vld [vmem:[#allocation2 + $0x300] ss:$8 sps:$4 sm:$0xff]  }
 0x2bb   : > { %v1205_v24 = vpop.f32.mrb[38].mxu1  ;;  %2043 = vmatprep.subr.bf16.mxu0 %v4810_v14  ;;  %v4837_v15 = vld [vmem:[#allocation2 + $0x314] ss:$8 sps:$4 sm:$0xff]   ;;  %v4840_v19 = vld [vmem:[#allocation2 + $0x324] ss:$8 sps:$4 sm:$0xff]  }
 0x2bc   : > { %v1206_v27 = vadd.f32 %v5661_v36, %v1205_v24  ;;  %v4581_v29 = vpop.f32.mrb[39].mxu1  ;;  %2059 = vmatprep.mubr.bf16.mxu0 %v1355_v22  ;;  %5174 = vtanh.bf16 %v1302_v21  ;;  %v4843_v22 = vld [vmem:[#allocation2 + $0x334] ss:$8 sps:$4 sm:$0xff]   ;;  %v4841_v24 = vld [vmem:[#allocation2 + $0x330] ss:$8 sps:$4 sm:$0xff]  }
 0x2bd   : > { %5176 = vtanh.bf16 %v1305_v18  ;;  %v1252_v29 = vmul.bf16 %v5703_v42, %v5703_v42 }
 0x2be   : > { %v5726_v30 = vpack.c.bf16 %v1206_v27, %v1203_v28  ;;  %2044 = vmatpush1.bf16.msra.mxu0 %v4808_v16  ;;  %v4838_v16 = vld [vmem:[#allocation2 + $0x320] ss:$8 sps:$4 sm:$0xff]   ;;  %v4849_v28 = vld [vmem:[#allocation2 + $0x354] ss:$8 sps:$4 sm:$0xff]   ;;  %v4852_v27 = vld [vmem:[#allocation2 + $0x364] ss:$8 sps:$4 sm:$0xff]  }
 0x2bf   : > { %2045 = vmatprep.subr.bf16.mxu0 %v4813_v26  ;;  %v4846_v26 = vld [vmem:[#allocation2 + $0x344] ss:$8 sps:$4 sm:$0xff]  }
 0x2c0   : > { %v1255_v55 = vmul.bf16 %v5726_v30, %v5726_v30 }
 0x2c1   : > { %v1210_v37 = vpop.f32.mrb[40].mxu1 }
 0x2c2   : > { %2046 = vmatpush1.bf16.msra.mxu0 %v4811_v31  ;;  %v4584_v52 = vpop.f32.mrb[41].mxu1  ;;  %v1211_v1 = vadd.f32 %v5661_v36, %v1210_v37  ;;  %v4850_v31 = vld [vmem:[#allocation2 + $0x360] ss:$8 sps:$4 sm:$0xff]   ;;  %v1268_v21 = vmul.bf16 %v1255_v55, %v5726_v30  ;;  %v4853_v37 = vld [vmem:[#allocation2 + $0x370] ss:$8 sps:$4 sm:$0xff]  }
 0x2c3   : > { %v1213_v20 = vpop.f32.mrb[42].mxu1  ;;  %2047 = vmatprep.subr.bf16.mxu0 %v4816_v33  ;;  %v1265_v33 = vmul.bf16 %v1252_v29, %v5703_v42  ;;  %v4858_v52 = vld [vmem:[#allocation2 + $0x384] ss:$8 sps:$4 sm:$0xff]   ;;  %v4904_v55 = vld [vmem:[#allocation2 + $0x480] ss:$8 sps:$4 sm:$0xff]  }
 0x2c4   : > { %v1214_v45 = vadd.f32 %v5661_v36, %v1213_v20  ;;  %v4585_v39 = vpop.f32.mrb[43].mxu1  ;;  %v1281_v18 = vmul.bf16 1027030327, %v1268_v21  ;;  %v4856_v20 = vld [vmem:[#allocation2 + $0x380] ss:$8 sps:$4 sm:$0xff]  }
 0x2c5   : > { %v5002_v21 = vld [vmem:[%s6206_s8 + $0x4] ss:$16 sps:$4 sm:$0xff]  }
 0x2c6   : > { %v5731_v46 = vpack.c.bf16 %v1214_v45, %v1211_v1  ;;  %2048 = vmatpush1.bf16.msra.mxu0 %v4814_v38  ;;  %v1278_v38 = vmul.bf16 1027030327, %v1265_v33  ;;  %v4859_v45 = vld [vmem:[#allocation2 + $0x390] ss:$8 sps:$4 sm:$0xff]   ;;  %v1294_v39 = vadd.bf16 %v1281_v18, %v5726_v30  ;;  %v4912_v18 = vld [vmem:[#allocation2 + $0x4a4] ss:$8 sps:$4 sm:$0xff]   ;;  %3379 = vmatprep.subr.bf16.mxu1 %v5002_v21 }
 0x2c7   : > { %2049 = vmatprep.subr.bf16.mxu0 %v4819_v43  ;;  %v5175_v57 = vpop.eup %5174  ;;  %v4861_v43 = vld [vmem:[#allocation2 + $0x394] ss:$8 sps:$4 sm:$0xff]   ;;  %v5000_v33 = vld [vmem:[%s6206_s8] ss:$16 sps:$4 sm:$0xff]   ;;  %v4960_v21 = vld [vmem:[#allocation2 + $0x5a4] ss:$8 sps:$4 sm:$0xff]  }
 0x2c8   : > { %v5177_v0 = vpop.eup %5176  ;;  %v1328_v40 = vadd.bf16 1065369472, %v5175_v57  ;;  %v1291_v1 = vadd.bf16 %v1278_v38, %v5703_v42  ;;  %v5005_v38 = vld [vmem:[%s6206_s8 + $0x24] ss:$16 sps:$4 sm:$0xff]   ;;  %3380 = vmatpush1.bf16.msra.mxu1 %v5000_v33  ;;  %v4955_v33 = vld [vmem:[#allocation2 + $0x590] ss:$8 sps:$4 sm:$0xff]  }
 0x2c9   : > { %v1218_v3 = vpop.f32.mrb[44].mxu1  ;;  %v1331_v11 = vadd.bf16 1065369472, %v5177_v0  ;;  %v4874_v0 = vld [vmem:[#allocation2 + $0x3e0] ss:$8 sps:$4 sm:$0xff]   ;;  %3381 = vmatprep.subr.bf16.mxu1 %v5005_v38 }
 0x2ca   : > { %2050 = vmatpush1.bf16.msra.mxu0 %v4817_v48  ;;  %v4588_v34 = vpop.f32.mrb[45].mxu1  ;;  %v1219_v56 = vadd.f32 %v5661_v36, %v1218_v3  ;;  %v1341_v13 = vmul.bf16 1056980736, %v1328_v40  ;;  %v4864_v48 = vld [vmem:[#allocation2 + $0x3a4] ss:$8 sps:$4 sm:$0xff]  }
 0x2cb   : > { %v1221_v53 = vpop.f32.mrb[46].mxu1  ;;  %2051 = vmatprep.subr.bf16.mxu0 %v4822_v50  ;;  %v1344_v14 = vmul.bf16 1056980736, %v1331_v11  ;;  %v1304_v50 = vmul.bf16 1061961548, %v1291_v1 }
 0x2cc   : > { %v1222_v58 = vadd.f32 %v5661_v36, %v1221_v53  ;;  %v4589_v59 = vpop.f32.mrb[47].mxu1  ;;  %v1354_v47 = vmul.bf16 %v1341_v13, %v5690_v9  ;;  %v4844_v9 = vld [vmem:[#allocation2 + $0x340] ss:$8 sps:$4 sm:$0xff]   ;;  %v1307_v34 = vmul.bf16 1061961548, %v1294_v39 }
 0x2cd   : > { %v1357_v49 = vmul.bf16 %v1344_v14, %v5710_v62  ;;  %v4847_v62 = vld [vmem:[#allocation2 + $0x350] ss:$8 sps:$4 sm:$0xff]   ;;  %v4862_v3 = vld [vmem:[#allocation2 + $0x3a0] ss:$8 sps:$4 sm:$0xff]   ;;  %5178 = vtanh.bf16 %v1304_v50  ;;  %v5008_v1 = vld [vmem:[%s6206_s8 + $0x44] ss:$16 sps:$4 sm:$0xff]  }
 0x2ce   : > { %v5735_v60 = vpack.c.bf16 %v1222_v58, %v1219_v56  ;;  %2052 = vmatpush1.bf16.msra.mxu0 %v4820_v51  ;;  %v4867_v51 = vld [vmem:[#allocation2 + $0x3b4] ss:$8 sps:$4 sm:$0xff]   ;;  %v4865_v53 = vld [vmem:[#allocation2 + $0x3b0] ss:$8 sps:$4 sm:$0xff]   ;;  %5180 = vtanh.bf16 %v1307_v34  ;;  %v4868_v56 = vld [vmem:[#allocation2 + $0x3c0] ss:$8 sps:$4 sm:$0xff]  }
 0x2cf   : > { %2053 = vmatprep.subr.bf16.mxu0 %v4825_v54  ;;  %v4870_v54 = vld [vmem:[#allocation2 + $0x3c4] ss:$8 sps:$4 sm:$0xff]   ;;  %v4873_v58 = vld [vmem:[#allocation2 + $0x3d4] ss:$8 sps:$4 sm:$0xff]   ;;  %v4871_v59 = vld [vmem:[#allocation2 + $0x3d0] ss:$8 sps:$4 sm:$0xff]  }
 0x2d0   : > { %v4883_v13 = vld [vmem:[#allocation2 + $0x410] ss:$8 sps:$4 sm:$0xff]   ;;  %v4886_v14 = vld [vmem:[#allocation2 + $0x420] ss:$8 sps:$4 sm:$0xff]  }
 0x2d1   : > { %v1226_v44 = vpop.f32.mrb[48].mxu1  ;;  %v5006_v50 = vld [vmem:[%s6206_s8 + $0x40] ss:$16 sps:$4 sm:$0xff]  }
 0x2d2   : > { %v1227_v25 = vadd.f32 %v5661_v36, %v1226_v44  ;;  %2054 = vmatpush1.bf16.msra.mxu0 %v4823_v61  ;;  %v4592_v5 = vpop.f32.mrb[49].mxu1  ;;  %v4876_v61 = vld [vmem:[#allocation2 + $0x3e4] ss:$8 sps:$4 sm:$0xff]   ;;  %v4879_v44 = vld [vmem:[#allocation2 + $0x3f4] ss:$8 sps:$4 sm:$0xff]  }
 0x2d3   : > { %v1229_v7 = vpop.f32.mrb[50].mxu1  ;;  %2055 = vmatprep.subr.bf16.mxu0 %v4828_v63  ;;  %v4913_v34 = vld [vmem:[#allocation2 + $0x4b0] ss:$8 sps:$4 sm:$0xff]  }
 0x2d4   : > { %v1230_v10 = vadd.f32 %v5661_v36, %v1229_v7  ;;  %v4593_v6 = vpop.f32.mrb[51].mxu1  ;;  %v4835_v36 = vld [vmem:[#allocation2 + $0x310] ss:$8 sps:$4 sm:$0xff]  }
 0x2d5   : > { %v4885_v6 = vld [vmem:[#allocation2 + $0x414] ss:$8 sps:$4 sm:$0xff]  }
 0x2d6   : > { %v5739_v12 = vpack.c.bf16 %v1230_v10, %v1227_v25  ;;  %2056 = vmatpush1.bf16.msra.mxu0 %v4826_v35  ;;  %v4877_v35 = vld [vmem:[#allocation2 + $0x3f0] ss:$8 sps:$4 sm:$0xff]   ;;  %v4880_v10 = vld [vmem:[#allocation2 + $0x400] ss:$8 sps:$4 sm:$0xff]  }
 0x2d7   : > { %2057 = vmatprep.subr.bf16.mxu0 %v4831_v8  ;;  %v4882_v8 = vld [vmem:[#allocation2 + $0x404] ss:$8 sps:$4 sm:$0xff]  }
 0x2d8   : > { %v5179_v63 = vpop.eup %5178 }
 0x2d9   : > { %v5181_v57 = vpop.eup %5180  ;;  %v1330_v25 = vadd.bf16 1065369472, %v5179_v63  ;;  %v4919_v63 = vld [vmem:[#allocation2 + $0x4d0] ss:$8 sps:$4 sm:$0xff]  }
 0x2da   : > { %2058 = vmatpush1.bf16.msra.mxu0 %v4829_v41  ;;  %v1333_v5 = vadd.bf16 1065369472, %v5181_v57  ;;  %v4924_v57 = vld [vmem:[#allocation2 + $0x4e4] ss:$8 sps:$4 sm:$0xff]  }
 0x2db   : > { %2267 = vmatprep.subr.bf16.mxu0 %v4834_v4  ;;  %v1343_v7 = vmul.bf16 1056980736, %v1330_v25  ;;  %v4888_v4 = vld [vmem:[#allocation2 + $0x424] ss:$8 sps:$4 sm:$0xff]  }
 0x2dc   : > { %v1346_v40 = vmul.bf16 1056980736, %v1333_v5  ;;  %v5020_v5 = vld [vmem:[%s6206_s8 + $0xc4] ss:$16 sps:$4 sm:$0xff]  }
 0x2dd   : > { %2060 = vmatmul.mubr.bf16.vlgmr.msra.gmra.mrb[28].mxu0 %v1354_v47  ;;  %v1356_v11 = vmul.bf16 %v1343_v7, %v5703_v42  ;;  %v4889_v47 = vld [vmem:[#allocation2 + $0x430] ss:$8 sps:$4 sm:$0xff]   ;;  %v4892_v42 = vld [vmem:[#allocation2 + $0x440] ss:$8 sps:$4 sm:$0xff]   ;;  %v4927_v7 = vld [vmem:[#allocation2 + $0x4f4] ss:$8 sps:$4 sm:$0xff]  }
 0x2de   : > { %2268 = vmatpush1.bf16.msra.mxu0 %v4832_v2  ;;  %2299 = vmatprep.mubr.bf16.mxu0 %v1357_v49  ;;  %v1359_v41 = vmul.bf16 %v1346_v40, %v5726_v30  ;;  %v4891_v2 = vld [vmem:[#allocation2 + $0x434] ss:$8 sps:$4 sm:$0xff]   ;;  %v4895_v30 = vld [vmem:[#allocation2 + $0x450] ss:$8 sps:$4 sm:$0xff]  }
 0x2df   : > { %2269 = vmatprep.subr.bf16.mxu0 %v4837_v15  ;;  %v4894_v15 = vld [vmem:[#allocation2 + $0x444] ss:$8 sps:$4 sm:$0xff]   ;;  %v4897_v49 = vld [vmem:[#allocation2 + $0x454] ss:$8 sps:$4 sm:$0xff]  }
 0x2e2   : > { %2270 = vmatpush1.bf16.msra.mxu0 %v4835_v36  ;;  %v4900_v36 = vld [vmem:[#allocation2 + $0x464] ss:$8 sps:$4 sm:$0xff]  }
 0x2e3   : > { %2271 = vmatprep.subr.bf16.mxu0 %v4840_v19  ;;  %v1254_v19 = vmul.bf16 %v5720_v23, %v5720_v23 }
 0x2e6   : > { %2272 = vmatpush1.bf16.msra.mxu0 %v4838_v16  ;;  %v1257_v16 = vmul.bf16 %v5735_v60, %v5735_v60 }
 0x2e7   : > { %2273 = vmatprep.subr.bf16.mxu0 %v4843_v22  ;;  %v4898_v22 = vld [vmem:[#allocation2 + $0x460] ss:$8 sps:$4 sm:$0xff]  }
 0x2ea   : > { %2274 = vmatpush1.bf16.msra.mxu0 %v4841_v24  ;;  %v4903_v24 = vld [vmem:[#allocation2 + $0x474] ss:$8 sps:$4 sm:$0xff]  }
 0x2eb   : > { %2275 = vmatprep.subr.bf16.mxu0 %v4846_v26  ;;  %v1267_v26 = vmul.bf16 %v1254_v19, %v5720_v23  ;;  %v4942_v19 = vld [vmem:[#allocation2 + $0x544] ss:$8 sps:$4 sm:$0xff]  }
 0x2ee   : > { %2276 = vmatpush1.bf16.msra.mxu0 %v4844_v9  ;;  %v1270_v9 = vmul.bf16 %v1257_v16, %v5735_v60  ;;  %v4945_v16 = vld [vmem:[#allocation2 + $0x554] ss:$8 sps:$4 sm:$0xff]  }
 0x2ef   : > { %2277 = vmatprep.subr.bf16.mxu0 %v4849_v28  ;;  %v4901_v28 = vld [vmem:[#allocation2 + $0x470] ss:$8 sps:$4 sm:$0xff]  }
 0x2f0   : > { %v1283_v29 = vmul.bf16 1027030327, %v1270_v9  ;;  %v4951_v9 = vld [vmem:[#allocation2 + $0x574] ss:$8 sps:$4 sm:$0xff]  }
 0x2f2   : > { %2278 = vmatpush1.bf16.msra.mxu0 %v4847_v62  ;;  %v4906_v62 = vld [vmem:[#allocation2 + $0x484] ss:$8 sps:$4 sm:$0xff]  }
 0x2f3   : > { %2279 = vmatprep.subr.bf16.mxu0 %v4852_v27  ;;  %v1280_v27 = vmul.bf16 1027030327, %v1267_v26  ;;  %v4946_v26 = vld [vmem:[#allocation2 + $0x560] ss:$8 sps:$4 sm:$0xff]  }
 0x2f6   : > { %2280 = vmatpush1.bf16.msra.mxu0 %v4850_v31  ;;  %v4909_v31 = vld [vmem:[#allocation2 + $0x494] ss:$8 sps:$4 sm:$0xff]  }
 0x2f7   : > { %2281 = vmatprep.subr.bf16.mxu0 %v4855_v32  ;;  %v1293_v32 = vadd.bf16 %v1280_v27, %v5720_v23  ;;  %v4954_v27 = vld [vmem:[#allocation2 + $0x584] ss:$8 sps:$4 sm:$0xff]  }
 0x2fa   : > { %2282 = vmatpush1.bf16.msra.mxu0 %v4853_v37  ;;  %v4907_v37 = vld [vmem:[#allocation2 + $0x490] ss:$8 sps:$4 sm:$0xff]  }
 0x2fb   : > { %2283 = vmatprep.subr.bf16.mxu0 %v4858_v52  ;;  %v1296_v52 = vadd.bf16 %v1283_v29, %v5735_v60 }
 0x2fd   : > { %v1309_v39 = vmul.bf16 1061961548, %v1296_v52 }
 0x2fe   : > { %2284 = vmatpush1.bf16.msra.mxu0 %v4856_v20  ;;  %v5003_v20 = vld [vmem:[%s6206_s8 + $0x20] ss:$16 sps:$4 sm:$0xff]  }
 0x2ff   : > { %2285 = vmatprep.subr.bf16.mxu0 %v4861_v43  ;;  %v1306_v43 = vmul.bf16 1061961548, %v1293_v32  ;;  %3382 = vmatpush1.bf16.msra.mxu1 %v5003_v20  ;;  %v4958_v20 = vld [vmem:[#allocation2 + $0x5a0] ss:$8 sps:$4 sm:$0xff]  }
 0x300   : > { %3383 = vmatprep.subr.bf16.mxu1 %v5008_v1  ;;  %v4963_v1 = vld [vmem:[#allocation2 + $0x5b4] ss:$8 sps:$4 sm:$0xff]  }
 0x301   : > { %5182 = vtanh.bf16 %v1306_v43 }
 0x302   : > { %2286 = vmatpush1.bf16.msra.mxu0 %v4859_v45  ;;  %v4910_v45 = vld [vmem:[#allocation2 + $0x4a0] ss:$8 sps:$4 sm:$0xff]   ;;  %5184 = vtanh.bf16 %v1309_v39  ;;  %v4966_v39 = vld [vmem:[#allocation2 + $0x5c4] ss:$8 sps:$4 sm:$0xff]  }
 0x303   : > { %2287 = vmatprep.subr.bf16.mxu0 %v4864_v48  ;;  %v4915_v48 = vld [vmem:[#allocation2 + $0x4b4] ss:$8 sps:$4 sm:$0xff]   ;;  %3384 = vmatpush1.bf16.msra.mxu1 %v5006_v50 }
 0x304   : > { %v4969_v50 = vld [vmem:[#allocation2 + $0x5d4] ss:$8 sps:$4 sm:$0xff]  }
 0x306   : > { %2288 = vmatpush1.bf16.msra.mxu0 %v4862_v3  ;;  %v5011_v3 = vld [vmem:[%s6206_s8 + $0x64] ss:$16 sps:$4 sm:$0xff]  }
 0x307   : > { %2289 = vmatprep.subr.bf16.mxu0 %v4867_v51  ;;  %v4918_v51 = vld [vmem:[#allocation2 + $0x4c4] ss:$8 sps:$4 sm:$0xff]   ;;  %3385 = vmatprep.subr.bf16.mxu1 %v5011_v3  ;;  %v4967_v3 = vld [vmem:[#allocation2 + $0x5d0] ss:$8 sps:$4 sm:$0xff]  }
 0x30a   : > { %2290 = vmatpush1.bf16.msra.mxu0 %v4865_v53  ;;  %v5009_v53 = vld [vmem:[%s6206_s8 + $0x60] ss:$16 sps:$4 sm:$0xff]  }
 0x30b   : > { %2291 = vmatprep.subr.bf16.mxu0 %v4870_v54  ;;  %v5014_v54 = vld [vmem:[%s6206_s8 + $0x84] ss:$16 sps:$4 sm:$0xff]   ;;  %3386 = vmatpush1.bf16.msra.mxu1 %v5009_v53  ;;  %v1258_v53 = vmul.bf16 %v5739_v12, %v5739_v12 }
 0x30c   : > { %3387 = vmatprep.subr.bf16.mxu1 %v5014_v54  ;;  %v4970_v54 = vld [vmem:[#allocation2 + $0x5e0] ss:$8 sps:$4 sm:$0xff]  }
 0x30e   : > { %2292 = vmatpush1.bf16.msra.mxu0 %v4868_v56  ;;  %v4916_v56 = vld [vmem:[#allocation2 + $0x4c0] ss:$8 sps:$4 sm:$0xff]  }
 0x30f   : > { %2293 = vmatprep.subr.bf16.mxu0 %v4873_v58  ;;  %v4921_v58 = vld [vmem:[#allocation2 + $0x4d4] ss:$8 sps:$4 sm:$0xff]  }
 0x312   : > { %2294 = vmatpush1.bf16.msra.mxu0 %v4871_v59  ;;  %v5012_v59 = vld [vmem:[%s6206_s8 + $0x80] ss:$16 sps:$4 sm:$0xff]  }
 0x313   : > { %2295 = vmatprep.subr.bf16.mxu0 %v4876_v61  ;;  %v5017_v61 = vld [vmem:[%s6206_s8 + $0xa4] ss:$16 sps:$4 sm:$0xff]   ;;  %3388 = vmatpush1.bf16.msra.mxu1 %v5012_v59  ;;  %v1271_v59 = vmul.bf16 %v1258_v53, %v5739_v12 }
 0x314   : > { %3389 = vmatprep.subr.bf16.mxu1 %v5017_v61  ;;  %v4973_v61 = vld [vmem:[#allocation2 + $0x5f0] ss:$8 sps:$4 sm:$0xff]  }
 0x316   : > { %2296 = vmatpush1.bf16.msra.mxu0 %v4874_v0  ;;  %v5183_v0 = vpop.eup %5182 }
 0x317   : > { %2297 = vmatprep.subr.bf16.mxu0 %v4879_v44  ;;  %v5015_v44 = vld [vmem:[%s6206_s8 + $0xa0] ss:$16 sps:$4 sm:$0xff]   ;;  %v5185_v25 = vpop.eup %5184 }
 0x318   : > { %v1335_v40 = vadd.bf16 1065369472, %v5185_v25  ;;  %3390 = vmatpush1.bf16.msra.mxu1 %v5015_v44  ;;  %v4976_v44 = vld [vmem:[%s6204_s6] ss:$8 sps:$4 sm:$0xff]  }
 0x319   : > { %3391 = vmatprep.subr.bf16.mxu1 %v5020_v5  ;;  %v4981_v5 = vld [vmem:[%s6204_s6 + $0x14] ss:$8 sps:$4 sm:$0xff]  }
 0x31a   : > { %2298 = vmatpush1.bf16.msra.mxu0 %v4877_v35  ;;  %v4922_v35 = vld [vmem:[#allocation2 + $0x4e0] ss:$8 sps:$4 sm:$0xff]  }
 0x31b   : > { %2507 = vmatprep.subr.bf16.mxu0 %v4882_v8  ;;  %v1332_v8 = vadd.bf16 1065369472, %v5183_v0  ;;  %v1284_v0 = vmul.bf16 1027030327, %v1271_v59 }
 0x31d   : > { %2300 = vmatmul.mubr.bf16.vlgmr.msra.gmra.mrb[28].mxu0 %v1356_v11  ;;  %v4925_v11 = vld [vmem:[#allocation2 + $0x4f0] ss:$8 sps:$4 sm:$0xff]  }
 0x31e   : > { %2508 = vmatpush1.bf16.msra.mxu0 %v4880_v10  ;;  %2539 = vmatprep.mubr.bf16.mxu0 %v1359_v41  ;;  %v5018_v10 = vld [vmem:[%s6206_s8 + $0xc0] ss:$16 sps:$4 sm:$0xff]   ;;  %v4930_v41 = vld [vmem:[#allocation2 + $0x504] ss:$8 sps:$4 sm:$0xff]  }
 0x31f   : > { %2509 = vmatprep.subr.bf16.mxu0 %v4885_v6  ;;  %v1345_v6 = vmul.bf16 1056980736, %v1332_v8  ;;  %3392 = vmatpush1.bf16.msra.mxu1 %v5018_v10  ;;  %v5250_v8 = vmov 0   ;;  %v4982_v10 = vld [vmem:[%s6204_s6 + $0x20] ss:$8 sps:$4 sm:$0xff]  }
 0x322   : > { %2510 = vmatpush1.bf16.msra.mxu0 %v4883_v13  ;;  %v1348_v13 = vmul.bf16 1056980736, %v1335_v40 }
 0x323   : > { %2511 = vmatprep.subr.bf16.mxu0 %v4888_v4  ;;  %v4928_v4 = vld [vmem:[#allocation2 + $0x500] ss:$8 sps:$4 sm:$0xff]  }
 0x326   : > { %2512 = vmatpush1.bf16.msra.mxu0 %v4886_v14  ;;  %v1358_v14 = vmul.bf16 %v1345_v6, %v5720_v23  ;;  %v4940_v23 = vld [vmem:[#allocation2 + $0x540] ss:$8 sps:$4 sm:$0xff]   ;;  %v4985_v6 = vld [vmem:[%s6204_s6 + $0x30] ss:$8 sps:$4 sm:$0xff]  }
 0x327   : > { %2513 = vmatprep.subr.bf16.mxu0 %v4891_v2  ;;  %v4933_v2 = vld [vmem:[#allocation2 + $0x514] ss:$8 sps:$4 sm:$0xff]  }
 0x32a   : > { %2514 = vmatpush1.bf16.msra.mxu0 %v4889_v47  ;;  %v1361_v47 = vmul.bf16 %v1348_v13, %v5735_v60  ;;  %v4943_v60 = vld [vmem:[#allocation2 + $0x550] ss:$8 sps:$4 sm:$0xff]   ;;  %v4988_v13 = vld [vmem:[%s6204_s6 + $0x40] ss:$8 sps:$4 sm:$0xff]  }
 0x32b   : > { %2515 = vmatprep.subr.bf16.mxu0 %v4894_v15  ;;  %v4931_v15 = vld [vmem:[#allocation2 + $0x510] ss:$8 sps:$4 sm:$0xff]  }
 0x32e   : > { %2516 = vmatpush1.bf16.msra.mxu0 %v4892_v42  ;;  %v4936_v42 = vld [vmem:[#allocation2 + $0x524] ss:$8 sps:$4 sm:$0xff]  }
 0x32f   : > { %2517 = vmatprep.subr.bf16.mxu0 %v4897_v49  ;;  %v4934_v49 = vld [vmem:[#allocation2 + $0x520] ss:$8 sps:$4 sm:$0xff]  }
 0x332   : > { %2518 = vmatpush1.bf16.msra.mxu0 %v4895_v30  ;;  %v4939_v30 = vld [vmem:[#allocation2 + $0x534] ss:$8 sps:$4 sm:$0xff]  }
 0x333   : > { %2519 = vmatprep.subr.bf16.mxu0 %v4900_v36  ;;  %v4937_v36 = vld [vmem:[#allocation2 + $0x530] ss:$8 sps:$4 sm:$0xff]  }
 0x336   : > { %2520 = vmatpush1.bf16.msra.mxu0 %v4898_v22  ;;  %v4948_v22 = vld [vmem:[#allocation2 + $0x564] ss:$8 sps:$4 sm:$0xff]  }
 0x337   : > { %2521 = vmatprep.subr.bf16.mxu0 %v4903_v24  ;;  %v1256_v24 = vmul.bf16 %v5731_v46, %v5731_v46 }
 0x33a   : > { %2522 = vmatpush1.bf16.msra.mxu0 %v4901_v28  ;;  %v1269_v28 = vmul.bf16 %v1256_v24, %v5731_v46  ;;  %v5027_v24 = vld [vmem:[%s6206_s8 + $0x120] ss:$16 sps:$4 sm:$0xff]  }
 0x33b   : > { %2523 = vmatprep.subr.bf16.mxu0 %v4906_v62  ;;  %v4949_v62 = vld [vmem:[#allocation2 + $0x570] ss:$8 sps:$4 sm:$0xff]  }
 0x33c   : > { %v1282_v29 = vmul.bf16 1027030327, %v1269_v28  ;;  %v5035_v28 = vld [vmem:[%s6206_s8 + $0x164] ss:$16 sps:$4 sm:$0xff]  }
 0x33e   : > { %2524 = vmatpush1.bf16.msra.mxu0 %v4904_v55  ;;  %v4952_v55 = vld [vmem:[#allocation2 + $0x580] ss:$8 sps:$4 sm:$0xff]   ;;  %v1295_v32 = vadd.bf16 %v1282_v29, %v5731_v46 }
 0x33f   : > { %2525 = vmatprep.subr.bf16.mxu0 %v4909_v31  ;;  %v4957_v31 = vld [vmem:[#allocation2 + $0x594] ss:$8 sps:$4 sm:$0xff]   ;;  %v5036_v29 = vld [vmem:[%s6206_s8 + $0x180] ss:$16 sps:$4 sm:$0xff]  }
 0x340   : > { %v1308_v52 = vmul.bf16 1061961548, %v1295_v32  ;;  %v5044_v32 = vld [vmem:[%s6206_s8 + $0x1c4] ss:$16 sps:$4 sm:$0xff]  }
 0x342   : > { %2526 = vmatpush1.bf16.msra.mxu0 %v4907_v37  ;;  %5186 = vtanh.bf16 %v1308_v52  ;;  %v5045_v52 = vld [vmem:[%s6206_s8 + $0x1e0] ss:$16 sps:$4 sm:$0xff]  }
 0x343   : > { %2527 = vmatprep.subr.bf16.mxu0 %v4912_v18 }
 0x346   : > { %2528 = vmatpush1.bf16.msra.mxu0 %v4910_v45  ;;  %v4961_v45 = vld [vmem:[#allocation2 + $0x5b0] ss:$8 sps:$4 sm:$0xff]  }
 0x347   : > { %2529 = vmatprep.subr.bf16.mxu0 %v4915_v48  ;;  %v4964_v48 = vld [vmem:[#allocation2 + $0x5c0] ss:$8 sps:$4 sm:$0xff]  }
 0x34a   : > { %2530 = vmatpush1.bf16.msra.mxu0 %v4913_v34  ;;  %v4972_v34 = vld [vmem:[#allocation2 + $0x5e4] ss:$8 sps:$4 sm:$0xff]  }
 0x34b   : > { %2531 = vmatprep.subr.bf16.mxu0 %v4918_v51 }
 0x34d   : > { %v5187_v51 = vpop.eup %5186 }
 0x34e   : > { %2532 = vmatpush1.bf16.msra.mxu0 %v4916_v56  ;;  %v4975_v56 = vld [vmem:[#allocation2 + $0x5f4] ss:$8 sps:$4 sm:$0xff]  }
 0x34f   : > { %2533 = vmatprep.subr.bf16.mxu0 %v4921_v58  ;;  %v1334_v58 = vadd.bf16 1065369472, %v5187_v51 }
 0x352   : > { %2534 = vmatpush1.bf16.msra.mxu0 %v4919_v63  ;;  %v1347_v63 = vmul.bf16 1056980736, %v1334_v58 }
 0x353   : > { %2535 = vmatprep.subr.bf16.mxu0 %v4924_v57  ;;  %v4978_v57 = vld [vmem:[%s6204_s6 + $0x4] ss:$8 sps:$4 sm:$0xff]  }
 0x354   : > { %v1360_v25 = vmul.bf16 %v1347_v63, %v5731_v46  ;;  %v4984_v46 = vld [vmem:[%s6204_s6 + $0x24] ss:$8 sps:$4 sm:$0xff]  }
 0x356   : > { %2536 = vmatpush1.bf16.msra.mxu0 %v4922_v35  ;;  %v1297_v35 = vadd.bf16 %v1284_v0, %v5739_v12 }
 0x357   : > { %2537 = vmatprep.subr.bf16.mxu0 %v4927_v7  ;;  %v4979_v7 = vld [vmem:[%s6204_s6 + $0x10] ss:$8 sps:$4 sm:$0xff]  }
 0x358   : > { %v1310_v40 = vmul.bf16 1061961548, %v1297_v35 }
 0x35a   : > { %2538 = vmatpush1.bf16.msra.mxu0 %v4925_v11  ;;  %v4987_v11 = vld [vmem:[%s6204_s6 + $0x34] ss:$8 sps:$4 sm:$0xff]   ;;  %5188 = vtanh.bf16 %v1310_v40 }
 0x35b   : > { %2747 = vmatprep.subr.bf16.mxu0 %v4930_v41  ;;  %v4990_v41 = vld [vmem:[%s6204_s6 + $0x44] ss:$8 sps:$4 sm:$0xff]  }
 0x35d   : > { %2540 = vmatmul.mubr.bf16.vlgmr.msra.gmra.mrb[28].mxu0 %v1358_v14  ;;  %v4991_v14 = vld [vmem:[%s6204_s6 + $0x50] ss:$8 sps:$4 sm:$0xff]  }
 0x35e   : > { %2748 = vmatpush1.bf16.msra.mxu0 %v4928_v4  ;;  %2779 = vmatprep.mubr.bf16.mxu0 %v1361_v47  ;;  %v4993_v4 = vld [vmem:[%s6204_s6 + $0x54] ss:$8 sps:$4 sm:$0xff]  }
 0x35f   : > { %2749 = vmatprep.subr.bf16.mxu0 %v4933_v2  ;;  %v4996_v2 = vld [vmem:[%s6204_s6 + $0x64] ss:$8 sps:$4 sm:$0xff]  }
 0x362   : > { %2750 = vmatpush1.bf16.msra.mxu0 %v4931_v15  ;;  %v4994_v15 = vld [vmem:[%s6204_s6 + $0x60] ss:$8 sps:$4 sm:$0xff]  }
 0x363   : > { %2751 = vmatprep.subr.bf16.mxu0 %v4936_v42  ;;  %v4999_v42 = vld [vmem:[%s6204_s6 + $0x74] ss:$8 sps:$4 sm:$0xff]  }
 0x365   : > { %v5189_v47 = vpop.eup %5188 }
 0x366   : > { %2752 = vmatpush1.bf16.msra.mxu0 %v4934_v49  ;;  %v1336_v49 = vadd.bf16 1065369472, %v5189_v47 }
 0x367   : > { %2753 = vmatprep.subr.bf16.mxu0 %v4939_v30  ;;  %v4997_v30 = vld [vmem:[%s6204_s6 + $0x70] ss:$8 sps:$4 sm:$0xff]  }
 0x36a   : > { %2754 = vmatpush1.bf16.msra.mxu0 %v4937_v36  ;;  %v1349_v36 = vmul.bf16 1056980736, %v1336_v49  ;;  %v5053_v49 = vld [vmem:[%s6206_s8 + $0x2c] ss:$16 sps:$4 sm:$0xff]  }
 0x36b   : > { %2755 = vmatprep.subr.bf16.mxu0 %v4942_v19 }
 0x36c   : > { %v1362_v19 = vmul.bf16 %v1349_v36, %v5739_v12  ;;  %v5029_v12 = vld [vmem:[%s6206_s8 + $0x124] ss:$16 sps:$4 sm:$0xff]   ;;  %v5056_v36 = vld [vmem:[%s6206_s8 + $0x4c] ss:$16 sps:$4 sm:$0xff]  }
 0x36e   : > { %2756 = vmatpush1.bf16.msra.mxu0 %v4940_v23  ;;  %v5023_v23 = vld [vmem:[%s6206_s8 + $0xe4] ss:$16 sps:$4 sm:$0xff]  }
 0x36f   : > { %2757 = vmatprep.subr.bf16.mxu0 %v4945_v16  ;;  %v5021_v16 = vld [vmem:[%s6206_s8 + $0xe0] ss:$16 sps:$4 sm:$0xff]   ;;  %3393 = vmatprep.subr.bf16.mxu1 %v5023_v23  ;;  %v5059_v23 = vld [vmem:[%s6206_s8 + $0x6c] ss:$16 sps:$4 sm:$0xff]  }
 0x370   : > { %3394 = vmatpush1.bf16.msra.mxu1 %v5021_v16  ;;  %v5057_v16 = vld [vmem:[%s6206_s8 + $0x68] ss:$16 sps:$4 sm:$0xff]  }
 0x372   : > { %2758 = vmatpush1.bf16.msra.mxu0 %v4943_v60  ;;  %v5026_v60 = vld [vmem:[%s6206_s8 + $0x104] ss:$16 sps:$4 sm:$0xff]  }
 0x373   : > { %2759 = vmatprep.subr.bf16.mxu0 %v4948_v22  ;;  %v5024_v22 = vld [vmem:[%s6206_s8 + $0x100] ss:$16 sps:$4 sm:$0xff]   ;;  %3395 = vmatprep.subr.bf16.mxu1 %v5026_v60  ;;  %v5062_v60 = vld [vmem:[%s6206_s8 + $0x8c] ss:$16 sps:$4 sm:$0xff]  }
 0x374   : > { %3396 = vmatpush1.bf16.msra.mxu1 %v5024_v22  ;;  %v5060_v22 = vld [vmem:[%s6206_s8 + $0x88] ss:$16 sps:$4 sm:$0xff]  }
 0x375   : > { %3397 = vmatprep.subr.bf16.mxu1 %v5029_v12  ;;  %v5065_v12 = vld [vmem:[%s6206_s8 + $0xac] ss:$16 sps:$4 sm:$0xff]  }
 0x376   : > { %2760 = vmatpush1.bf16.msra.mxu0 %v4946_v26  ;;  %v5032_v26 = vld [vmem:[%s6206_s8 + $0x144] ss:$16 sps:$4 sm:$0xff]  }
 0x377   : > { %2761 = vmatprep.subr.bf16.mxu0 %v4951_v9  ;;  %v5030_v9 = vld [vmem:[%s6206_s8 + $0x140] ss:$16 sps:$4 sm:$0xff]  }
 0x378   : > { %3398 = vmatpush1.bf16.msra.mxu1 %v5027_v24  ;;  %v5063_v24 = vld [vmem:[%s6206_s8 + $0xa8] ss:$16 sps:$4 sm:$0xff]  }
 0x379   : > { %3399 = vmatprep.subr.bf16.mxu1 %v5032_v26  ;;  %v5068_v26 = vld [vmem:[%s6206_s8 + $0xcc] ss:$16 sps:$4 sm:$0xff]  }
 0x37a   : > { %2762 = vmatpush1.bf16.msra.mxu0 %v4949_v62  ;;  %v5033_v62 = vld [vmem:[%s6206_s8 + $0x160] ss:$16 sps:$4 sm:$0xff]  }
 0x37b   : > { %2763 = vmatprep.subr.bf16.mxu0 %v4954_v27  ;;  %v5038_v27 = vld [vmem:[%s6206_s8 + $0x184] ss:$16 sps:$4 sm:$0xff]  }
 0x37c   : > { %3400 = vmatpush1.bf16.msra.mxu1 %v5030_v9  ;;  %v5066_v9 = vld [vmem:[%s6206_s8 + $0xc8] ss:$16 sps:$4 sm:$0xff]  }
 0x37d   : > { %3401 = vmatprep.subr.bf16.mxu1 %v5035_v28  ;;  %v5071_v28 = vld [vmem:[%s6206_s8 + $0xec] ss:$16 sps:$4 sm:$0xff]  }
 0x37e   : > { %2764 = vmatpush1.bf16.msra.mxu0 %v4952_v55  ;;  %v5041_v55 = vld [vmem:[%s6206_s8 + $0x1a4] ss:$16 sps:$4 sm:$0xff]  }
 0x37f   : > { %2765 = vmatprep.subr.bf16.mxu0 %v4957_v31  ;;  %v5039_v31 = vld [vmem:[%s6206_s8 + $0x1a0] ss:$16 sps:$4 sm:$0xff]  }
 0x380   : > { %v5809_v37 = vpop.f32.mrb[52].mxu1  ;;  %3402 = vmatpush1.bf16.msra.mxu1 %v5033_v62  ;;  %v5069_v62 = vld [vmem:[%s6206_s8 + $0xe8] ss:$16 sps:$4 sm:$0xff]  }
 0x381   : > { %v5811_v38 = vpop.f32.mrb[53].mxu1  ;;  %3403 = vmatprep.subr.bf16.mxu1 %v5038_v27  ;;  %v5074_v27 = vld [vmem:[%s6206_s8 + $0x10c] ss:$16 sps:$4 sm:$0xff]  }
 0x382   : > { %2766 = vmatpush1.bf16.msra.mxu0 %v4955_v33  ;;  %v5813_v18 = vpop.f32.mrb[54].mxu1  ;;  %v5042_v33 = vld [vmem:[%s6206_s8 + $0x1c0] ss:$16 sps:$4 sm:$0xff]  }
 0x383   : > { %v5815_v43 = vpop.f32.mrb[55].mxu1  ;;  %2767 = vmatprep.subr.bf16.mxu0 %v4960_v21  ;;  %v5047_v21 = vld [vmem:[%s6206_s8 + $0x1e4] ss:$16 sps:$4 sm:$0xff]  }
 0x384   : > { %3404 = vmatpush1.bf16.msra.mxu1 %v5036_v29  ;;  %v5072_v29 = vld [vmem:[%s6206_s8 + $0x108] ss:$16 sps:$4 sm:$0xff]  }
 0x385   : > { %3405 = vmatprep.subr.bf16.mxu1 %v5041_v55  ;;  %v5077_v55 = vld [vmem:[%s6206_s8 + $0x12c] ss:$16 sps:$4 sm:$0xff]  }
 0x386   : > { %2768 = vmatpush1.bf16.msra.mxu0 %v4958_v20  ;;  %v5050_v20 = vld [vmem:[%s6206_s8 + $0xc] ss:$16 sps:$4 sm:$0xff]  }
 0x387   : > { %2769 = vmatprep.subr.bf16.mxu0 %v4963_v1  ;;  %v2939_v1 = vlaneseq }
 0x388   : > { %3406 = vmatpush1.bf16.msra.mxu1 %v5039_v31  ;;  %v5075_v31 = vld [vmem:[%s6206_s8 + $0x128] ss:$16 sps:$4 sm:$0xff]  }
 0x389   : > { %3407 = vmatprep.subr.bf16.mxu1 %v5044_v32  ;;  %v5080_v32 = vld [vmem:[%s6206_s8 + $0x14c] ss:$16 sps:$4 sm:$0xff]  }
 0x38a   : > { %2770 = vmatpush1.bf16.msra.mxu0 %v4961_v45  ;;  %v5928_v45 = vshrl.u32 %v2939_v1, 7  ;;  %v5084_v1 = vld [vmem:[%s6206_s8 + $0x188] ss:$16 sps:$4 sm:$0xff]  }
 0x38b   : > { %2771 = vmatprep.subr.bf16.mxu0 %v4966_v39 }
 0x38c   : > { %3408 = vmatpush1.bf16.msra.mxu1 %v5042_v33  ;;  %v2941_v39 = vsub.s32 0, %v5928_v45  ;;  %v5078_v33 = vld [vmem:[%s6206_s8 + $0x148] ss:$16 sps:$4 sm:$0xff]  }
 0x38d   : > { %3409 = vmatprep.subr.bf16.mxu1 %v5047_v21  ;;  %v5083_v21 = vld [vmem:[%s6206_s8 + $0x16c] ss:$16 sps:$4 sm:$0xff]  }
 0x38e   : > { %2772 = vmatpush1.bf16.msra.mxu0 %v4964_v48  ;;  %v2937_v48 = vld [vmem:[%s6205_s7] sm:$0x3] }
 0x38f   : > { %2773 = vmatprep.subr.bf16.mxu0 %v4969_v50  ;;  %v2945_v50 = vsub.s32 1, %v5928_v45  ;;  %v2942_v51 = vrot.slane %v2937_v48, %v2941_v39 }
 0x390   : > { %3410 = vmatpush1.bf16.msra.mxu1 %v5045_v52  ;;  %v5081_v52 = vld [vmem:[%s6206_s8 + $0x168] ss:$16 sps:$4 sm:$0xff]  }
 0x391   : > { %3422 = vmatprep.subr.bf16.mxu1 %v5050_v20  ;;  %v5086_v20 = vld [vmem:[%s6206_s8 + $0x18c] ss:$16 sps:$4 sm:$0xff]  }
 0x392   : > { %2774 = vmatpush1.bf16.msra.mxu0 %v4967_v3 }
 0x393   : > { %2775 = vmatprep.subr.bf16.mxu0 %v4972_v34 }
 0x396   : > { %2776 = vmatpush1.bf16.msra.mxu0 %v4970_v54 }
 0x397   : > { %2777 = vmatprep.subr.bf16.mxu0 %v4975_v56  ;;  %v2946_v56 = vrot.slane %v2937_v48, %v2945_v50  ;;  %v5089_v48 = vld [vmem:[%s6206_s8 + $0x1ac] ss:$16 sps:$4 sm:$0xff]  }
 0x39a   : > { %2778 = vmatpush1.bf16.msra.mxu0 %v4973_v61 }
 0x39b   : > { %2890 = vmatprep.subr.bf16.mxu0 %v4978_v57 }
 0x39d   : > { %2780 = vmatmul.mubr.bf16.vlgmr.msra.gmra.mrb[28].mxu0 %v1360_v25 }
 0x39e   : > { %2891 = vmatpush1.bf16.msra.mxu0 %v4976_v44  ;;  %2922 = vmatprep.mubr.bf16.mxu0 %v5250_v8 }
 0x39f   : > { %2892 = vmatprep.subr.bf16.mxu0 %v4981_v5 }
 0x3a2   : > { %2893 = vmatpush1.bf16.msra.mxu0 %v4979_v7 }
 0x3a3   : > { %2894 = vmatprep.subr.bf16.mxu0 %v4984_v46 }
 0x3a6   : > { %2895 = vmatpush1.bf16.msra.mxu0 %v4982_v10 }
 0x3a7   : > { %2896 = vmatprep.subr.bf16.mxu0 %v4987_v11 }
 0x3aa   : > { %2897 = vmatpush1.bf16.msra.mxu0 %v4985_v6 }
 0x3ab   : > { %2898 = vmatprep.subr.bf16.mxu0 %v4990_v41 }
 0x3ae   : > { %2899 = vmatpush1.bf16.msra.mxu0 %v4988_v13 }
 0x3af   : > { %2900 = vmatprep.subr.bf16.mxu0 %v4993_v4 }
 0x3b2   : > { %2901 = vmatpush1.bf16.msra.mxu0 %v4991_v14 }
 0x3b3   : > { %2902 = vmatprep.subr.bf16.mxu0 %v4996_v2 }
 0x3b6   : > { %2903 = vmatpush1.bf16.msra.mxu0 %v4994_v15  ;;  %v5048_v15 = vld [vmem:[%s6206_s8 + $0x8] ss:$16 sps:$4 sm:$0xff]  }
 0x3b7   : > { %2904 = vmatprep.subr.bf16.mxu0 %v4999_v42 }
 0x3ba   : > { %2905 = vmatpush1.bf16.msra.mxu0 %v4997_v30  ;;  %v5051_v30 = vld [vmem:[%s6206_s8 + $0x28] ss:$16 sps:$4 sm:$0xff]  }
 0x3bd   : > { %2923 = vmatmul.mubr.bf16.vlgmr.msra.gmra.mrb[28].mxu0 %v1362_v19  ;;  %v5054_v19 = vld [vmem:[%s6206_s8 + $0x48] ss:$16 sps:$4 sm:$0xff]  }
 0x490   : > { %v2924_v3 = vpop.f32.mrb[28].mxu0 }
 0x491   : > { %v4614_v34 = vadd.f32 %v2924_v3, %v5809_v37  ;;  %v2926_v53 = vpop.f32.mrb[29].mxu0  ;;  %v5087_v3 = vld [vmem:[%s6206_s8 + $0x1a8] ss:$16 sps:$4 sm:$0xff]  }
 0x492   : > { %v4615_v54 = vadd.f32 %v2926_v53, %v5811_v38  ;;  %v2928_v58 = vpop.f32.mrb[30].mxu0  ;;  %v5095_v53 = vld [vmem:[%s6206_s8 + $0x1ec] ss:$16 sps:$4 sm:$0xff]  }
 0x493   : > { %v4616_v59 = vadd.f32 %v2928_v58, %v5813_v18  ;;  %v2930_v61 = vpop.f32.mrb[31].mxu0  ;;  %v2949_v57 = vadd.f32 %v4614_v34, %v2942_v51  ;;  %v5092_v34 = vld [vmem:[%s6206_s8 + $0x1cc] ss:$16 sps:$4 sm:$0xff]   ;;  %v5097_v58 = vld [vmem:[%s6208_s10] sm:$0xff]  }
 0x494   : > { %v4617_v63 = vadd.f32 %v2930_v61, %v5815_v43  ;;  %v2950_v44 = vadd.f32 %v4615_v54, %v2946_v56  ;;  %v5093_v54 = vld [vmem:[%s6206_s8 + $0x1e8] ss:$16 sps:$4 sm:$0xff]  }
 0x495   : > { %v2951_v0 = vadd.f32 %v4616_v59, %v2942_v51  ;;  %v5090_v51 = vld [vmem:[%s6206_s8 + $0x1c8] ss:$16 sps:$4 sm:$0xff]  }
 0x496   : > { %v2952_v25 = vadd.f32 %v4617_v63, %v2946_v56  ;;  %v5096_v56 = vld [vmem:[%s6208_s10 + $0x40] sm:$0xff]   ;;  %v5098_v59 = vld [vmem:[%s6208_s10 + $0x48] sm:$0xff]   ;;  %v5100_v63 = vld [vmem:[%s6208_s10 + $0x50] sm:$0xff]  }
 0x497   : > { %v2953_v37 = vpack.c.bf16 %v2951_v0, %v2949_v57  ;;  %v5099_v61 = vld [vmem:[%s6208_s10 + $0x8] sm:$0xff]   ;;  %v5101_v57 = vld [vmem:[%s6208_s10 + $0x10] sm:$0xff]   ;;  %v5102_v0 = vld [vmem:[%s6208_s10 + $0x58] sm:$0xff]  }
 0x498   : > { %v2954_v5 = vpack.c.bf16 %v2952_v25, %v2950_v44  ;;  %v5103_v44 = vld [vmem:[%s6208_s10 + $0x18] sm:$0xff]   ;;  %v5104_v25 = vld [vmem:[%s6208_s10 + $0x60] sm:$0xff]  }
 0x499   : > { %v2955_v35 = vmul.bf16 %v2953_v37, %v2953_v37 }
 0x49a   : > { %v2956_v7 = vmul.bf16 %v2954_v5, %v2954_v5 }
 0x49b   : > { %v2957_v8 = vmul.bf16 %v2955_v35, %v2953_v37  ;;  %v5107_v35 = vld [vmem:[%s6208_s10 + $0x28] sm:$0xff]  }
 0x49c   : > { %v2958_v46 = vmul.bf16 %v2956_v7, %v2954_v5  ;;  %v5108_v7 = vld [vmem:[%s6208_s10 + $0x70] sm:$0xff]  }
 0x49d   : > { %v2959_v38 = vmul.bf16 1027030327, %v2957_v8  ;;  %v5109_v8 = vld [vmem:[%s6208_s10 + $0x30] sm:$0xff]  }
 0x49e   : > { %v2960_v40 = vmul.bf16 1027030327, %v2958_v46  ;;  %v5110_v46 = vld [vmem:[%s6208_s10 + $0x78] sm:$0xff]  }
 0x49f   : > { %v2961_v10 = vadd.bf16 %v2959_v38, %v2953_v37  ;;  %v5111_v38 = vld [vmem:[%s6208_s10 + $0x38] sm:$0xff]  }
 0x4a0   : > { %v2962_v11 = vadd.bf16 %v2960_v40, %v2954_v5  ;;  %v5112_v40 = vld [vmem:[%s6208_s10 + $0xc0] sm:$0xff]  }
 0x4a1   : > { %v2963_v6 = vmul.bf16 1061961548, %v2961_v10  ;;  %v6094_v10 = vld [vmem:[%s6207_s9] sm:$0xf] }
 0x4a2   : > { %v2964_v41 = vmul.bf16 1061961548, %v2962_v11  ;;  %v3042_v11 = vrot.slane %v6094_v10, %v2941_v39 }
 0x4a3   : > { %5190 = vtanh.bf16 %v2963_v6 }
 0x4a4   : > { %5192 = vtanh.bf16 %v2964_v41  ;;  %v3046_v41 = vrot.slane %v6094_v10, %v2945_v50 }
 0x4ae   : > { %v5191_v18 = vpop.eup %5190 }
 0x4af   : > { %v5193_v43 = vpop.eup %5192  ;;  %v2967_v13 = vadd.bf16 1065369472, %v5191_v18 }
 0x4b0   : > { %v2968_v4 = vadd.bf16 1065369472, %v5193_v43 }
 0x4b1   : > { %v2969_v14 = vmul.bf16 1056980736, %v2967_v13 }
 0x4b2   : > { %v2970_v2 = vmul.bf16 1056980736, %v2968_v4 }
 0x4b3   : > { %v5946_v42 = vmul.bf16 %v2969_v14, %v2953_v37  ;;  %v5105_v37 = vld [vmem:[%s6208_s10 + $0x20] sm:$0xff]  }
 0x4b4   : > { %v2972_v47 = vmul.bf16 %v2970_v2, %v2954_v5  ;;  %v5106_v5 = vld [vmem:[%s6208_s10 + $0x68] sm:$0xff]  }
 0x4b6   : > { %3411 = vmatprep.mubr.bf16.mxu1 %v2972_v47 }
 0x4b7   : > { %3412 = vmatmul.mubr.bf16.vlgmr.msra.gmra.mrb[56].mxu1 %v5946_v42 }
 0x4b8   : > { %3423 = vmatpush1.bf16.msra.mxu1 %v5048_v15  ;;  %3454 = vmatprep.mubr.bf16.mxu1 %v2972_v47 }
 0x4b9   : > { %3424 = vmatprep.subr.bf16.mxu1 %v5053_v49 }
 0x4bc   : > { %3425 = vmatpush1.bf16.msra.mxu1 %v5051_v30 }
 0x4bd   : > { %3426 = vmatprep.subr.bf16.mxu1 %v5056_v36 }
 0x4c0   : > { %3427 = vmatpush1.bf16.msra.mxu1 %v5054_v19 }
 0x4c1   : > { %3428 = vmatprep.subr.bf16.mxu1 %v5059_v23 }
 0x4c4   : > { %3429 = vmatpush1.bf16.msra.mxu1 %v5057_v16 }
 0x4c5   : > { %3430 = vmatprep.subr.bf16.mxu1 %v5062_v60 }
 0x4c8   : > { %3431 = vmatpush1.bf16.msra.mxu1 %v5060_v22 }
 0x4c9   : > { %3432 = vmatprep.subr.bf16.mxu1 %v5065_v12 }
 0x4cc   : > { %3433 = vmatpush1.bf16.msra.mxu1 %v5063_v24 }
 0x4cd   : > { %3434 = vmatprep.subr.bf16.mxu1 %v5068_v26 }
 0x4d0   : > { %3435 = vmatpush1.bf16.msra.mxu1 %v5066_v9 }
 0x4d1   : > { %3436 = vmatprep.subr.bf16.mxu1 %v5071_v28 }
 0x4d4   : > { %3437 = vmatpush1.bf16.msra.mxu1 %v5069_v62 }
 0x4d5   : > { %3438 = vmatprep.subr.bf16.mxu1 %v5074_v27 }
 0x4d8   : > { %3439 = vmatpush1.bf16.msra.mxu1 %v5072_v29  ;;  %v5113_v29 = vld [vmem:[%s6208_s10 + $0x80] sm:$0xff]  }
 0x4d9   : > { %3440 = vmatprep.subr.bf16.mxu1 %v5077_v55 }
 0x4dc   : > { %3441 = vmatpush1.bf16.msra.mxu1 %v5075_v31  ;;  %v5114_v31 = vld [vmem:[%s6208_s10 + $0xc8] sm:$0xff]  }
 0x4dd   : > { %3442 = vmatprep.subr.bf16.mxu1 %v5080_v32  ;;  %v5115_v32 = vld [vmem:[%s6208_s10 + $0x88] sm:$0xff]  }
 0x4e0   : > { %3443 = vmatpush1.bf16.msra.mxu1 %v5078_v33  ;;  %v5116_v33 = vld [vmem:[%s6208_s10 + $0xd0] sm:$0xff]  }
 0x4e1   : > { %3444 = vmatprep.subr.bf16.mxu1 %v5083_v21  ;;  %v5117_v21 = vld [vmem:[%s6208_s10 + $0x90] sm:$0xff]  }
 0x4e4   : > { %3445 = vmatpush1.bf16.msra.mxu1 %v5081_v52  ;;  %v5118_v52 = vld [vmem:[%s6208_s10 + $0xd8] sm:$0xff]  }
 0x4e5   : > { %3446 = vmatprep.subr.bf16.mxu1 %v5086_v20  ;;  %v5119_v20 = vld [vmem:[%s6208_s10 + $0x98] sm:$0xff]  }
 0x4e8   : > { %3447 = vmatpush1.bf16.msra.mxu1 %v5084_v1  ;;  %v5120_v1 = vld [vmem:[%s6208_s10 + $0xe0] sm:$0xff]  }
 0x4e9   : > { %3448 = vmatprep.subr.bf16.mxu1 %v5089_v48  ;;  %v5121_v48 = vld [vmem:[%s6208_s10 + $0xa0] sm:$0xff]  }
 0x4ec   : > { %3449 = vmatpush1.bf16.msra.mxu1 %v5087_v3  ;;  %v5122_v3 = vld [vmem:[%s6208_s10 + $0xe8] sm:$0xff]  }
 0x4ed   : > { %3450 = vmatprep.subr.bf16.mxu1 %v5092_v34  ;;  %v5123_v34 = vld [vmem:[%s6208_s10 + $0xa8] sm:$0xff]  }
 0x4f0   : > { %3451 = vmatpush1.bf16.msra.mxu1 %v5090_v51  ;;  %v5124_v51 = vld [vmem:[%s6208_s10 + $0xf0] sm:$0xff]  }
 0x4f1   : > { %3452 = vmatprep.subr.bf16.mxu1 %v5095_v53  ;;  %v5125_v53 = vld [vmem:[%s6208_s10 + $0xb0] sm:$0xff]  }
 0x4f4   : > { %3453 = vmatpush1.bf16.msra.mxu1 %v5093_v54  ;;  %v3049_v54 = vsub.s32 2, %v5928_v45 }
 0x4f5   : > { %4443 = vmatprep.subr.bf16.mxu1 %v5096_v56  ;;  %v5126_v56 = vld [vmem:[%s6208_s10 + $0xf8] sm:$0xff]  }
 0x4f7   : > { %3455 = vmatmul.mubr.bf16.vlgmr.msra.gmra.mrb[60].mxu1 %v5946_v42 }
 0x4f8   : > { %4444 = vmatpush3.bf16.msra.mxu1 %v5097_v58  ;;  %v3053_v58 = vsub.s32 3, %v5928_v45 }
 0x4f9   : > { %4445 = vmatprep.subr.bf16.mxu1 %v5098_v59  ;;  %v5127_v59 = vld [vmem:[%s6208_s10 + $0xb8] sm:$0xff]  }
 0x4fc   : > { %4446 = vmatpush3.bf16.msra.mxu1 %v5099_v61  ;;  %v3050_v61 = vrot.slane %v6094_v10, %v3049_v54 }
 0x4fd   : > { %4447 = vmatprep.subr.bf16.mxu1 %v5100_v63 }
 0x500   : > { %4448 = vmatpush3.bf16.msra.mxu1 %v5101_v57  ;;  %v3054_v57 = vrot.slane %v6094_v10, %v3053_v58 }
 0x501   : > { %4449 = vmatprep.subr.bf16.mxu1 %v5102_v0 }
 0x504   : > { %4450 = vmatpush3.bf16.msra.mxu1 %v5103_v44 }
 0x505   : > { %4451 = vmatprep.subr.bf16.mxu1 %v5104_v25 }
 0x508   : > { %4452 = vmatpush3.bf16.msra.mxu1 %v5105_v37 }
 0x509   : > { %4453 = vmatprep.subr.bf16.mxu1 %v5106_v5 }
 0x50c   : > { %4454 = vmatpush3.bf16.msra.mxu1 %v5107_v35 }
 0x50d   : > { %4455 = vmatprep.subr.bf16.mxu1 %v5108_v7 }
 0x510   : > { %4456 = vmatpush3.bf16.msra.mxu1 %v5109_v8 }
 0x511   : > { %4457 = vmatprep.subr.bf16.mxu1 %v5110_v46 }
 0x514   : > { %4458 = vmatpush3.bf16.msra.mxu1 %v5111_v38 }
 0x515   : > { %4465 = vmatprep.subr.bf16.mxu1 %v5112_v40 }
 0x58a   : > { %v3413_v6 = vpop.f32.mrb[56].mxu1 }
 0x58b   : > { %v3415_v18 = vpop.f32.mrb[57].mxu1  ;;  %v3414_v13 = vadd.f32 %v3413_v6, %v3042_v11 }
 0x58c   : > { %v3417_v43 = vpop.f32.mrb[58].mxu1  ;;  %v3416_v2 = vadd.f32 %v3415_v18, %v3046_v41 }
 0x58d   : > { %v3418_v4 = vadd.f32 %v3417_v43, %v3042_v11  ;;  %v3419_v14 = vpop.f32.mrb[59].mxu1 }
 0x58e   : > { %v3420_v47 = vadd.f32 %v3419_v14, %v3046_v41 }
 0x58f   : > { %v3465_v15 = vpack.c.bf16 %v3418_v4, %v3414_v13 }
 0x590   : > { %v3466_v42 = vpack.c.bf16 %v3420_v47, %v3416_v2 }
 0x591   : > { %v3469_v49 = vmul.bf16 %v3465_v15, %v3465_v15 }
 0x592   : > { %v3470_v30 = vmul.bf16 %v3466_v42, %v3466_v42 }
 0x593   : > { %v3473_v36 = vmul.bf16 %v3469_v49, %v3465_v15 }
 0x594   : > { %v3474_v19 = vmul.bf16 %v3470_v30, %v3466_v42 }
 0x595   : > { %v3477_v23 = vmul.bf16 1027030327, %v3473_v36  ;;  %v5128_v36 = vld [vmem:[%s6210_s12] sm:$0xff]  }
 0x596   : > { %v3478_v39 = vmul.bf16 1027030327, %v3474_v19  ;;  %v5129_v19 = vld [vmem:[%s6210_s12 + $0x8] sm:$0xff]  }
 0x597   : > { %v3481_v16 = vadd.bf16 %v3477_v23, %v3465_v15  ;;  %v5130_v23 = vld [vmem:[%s6210_s12 + $0x10] sm:$0xff]  }
 0x598   : > { %v3482_v60 = vadd.bf16 %v3478_v39, %v3466_v42  ;;  %v5131_v39 = vld [vmem:[%s6210_s12 + $0x18] sm:$0xff]  }
 0x599   : > { %v3485_v22 = vmul.bf16 1061961548, %v3481_v16  ;;  %v5132_v16 = vld [vmem:[%s6210_s12 + $0x20] sm:$0xff]  }
 0x59a   : > { %v3486_v12 = vmul.bf16 1061961548, %v3482_v60  ;;  %v5133_v60 = vld [vmem:[%s6210_s12 + $0x28] sm:$0xff]  }
 0x59b   : > { %5194 = vtanh.bf16 %v3485_v22  ;;  %v5134_v22 = vld [vmem:[%s6210_s12 + $0x30] sm:$0xff]  }
 0x59c   : > { %5196 = vtanh.bf16 %v3486_v12  ;;  %v5135_v12 = vld [vmem:[%s6210_s12 + $0x38] sm:$0xff]  }
 0x5a6   : > { %v5195_v50 = vpop.eup %5194 }
 0x5a7   : > { %v5197_v24 = vpop.eup %5196  ;;  %v3493_v26 = vadd.bf16 1065369472, %v5195_v50 }
 0x5a8   : > { %v3494_v9 = vadd.bf16 1065369472, %v5197_v24 }
 0x5a9   : > { %v3497_v28 = vmul.bf16 1056980736, %v3493_v26 }
 0x5aa   : > { %v3498_v62 = vmul.bf16 1056980736, %v3494_v9 }
 0x5ab   : > { %v3501_v55 = vmul.bf16 %v3497_v28, %v3465_v15 }
 0x5ac   : > { %v3502_v27 = vmul.bf16 %v3498_v62, %v3466_v42 }
 0x5ae   : > { %3800 = vmatprep.mubr.bf16.mxu1 %v3502_v27  ;;  %v4363_v27 = vld [vmem:[%s6209_s11] ss:$0 sm:$0xff] }
 0x5af   : > { %3801 = vmatmul.mubr.bf16.vlgmr.msra.gmra.mrb[64].mxu1 %v3501_v55 }
 0x5b0   : > { %4466 = vmatpush3.bf16.msra.mxu1 %v5113_v29 }
 0x5b1   : > { %4467 = vmatprep.subr.bf16.mxu1 %v5114_v31 }
 0x5b4   : > { %4468 = vmatpush3.bf16.msra.mxu1 %v5115_v32 }
 0x5b5   : > { %4469 = vmatprep.subr.bf16.mxu1 %v5116_v33 }
 0x5b8   : > { %4470 = vmatpush3.bf16.msra.mxu1 %v5117_v21 }
 0x5b9   : > { %4471 = vmatprep.subr.bf16.mxu1 %v5118_v52 }
 0x5bc   : > { %4472 = vmatpush3.bf16.msra.mxu1 %v5119_v20 }
 0x5bd   : > { %4473 = vmatprep.subr.bf16.mxu1 %v5120_v1 }
 0x5c0   : > { %4474 = vmatpush3.bf16.msra.mxu1 %v5121_v48 }
 0x5c1   : > { %4475 = vmatprep.subr.bf16.mxu1 %v5122_v3 }
 0x5c4   : > { %4476 = vmatpush3.bf16.msra.mxu1 %v5123_v34 }
 0x5c5   : > { %4477 = vmatprep.subr.bf16.mxu1 %v5124_v51 }
 0x5c8   : > { %4478 = vmatpush3.bf16.msra.mxu1 %v5125_v53 }
 0x5c9   : > { %4479 = vmatprep.subr.bf16.mxu1 %v5126_v56 }
 0x5ca   : > { %v3456_v63 = vpop.f32.mrb[60].mxu1 }
 0x5cb   : > { %v3458_v0 = vpop.f32.mrb[61].mxu1  ;;  %v3457_v25 = vadd.f32 %v3456_v63, %v3050_v61  ;;  %v4396_v63 = vld [vmem:[%s6211_s13] ss:$0 sm:$0xff] }
 0x5cc   : > { %v3460_v44 = vpop.f32.mrb[62].mxu1  ;;  %4480 = vmatpush3.bf16.msra.mxu1 %v5127_v59  ;;  %v3459_v45 = vadd.f32 %v3458_v0, %v3054_v57 }
 0x5cd   : > { %v3461_v37 = vadd.f32 %v3460_v44, %v3050_v61  ;;  %v3462_v5 = vpop.f32.mrb[63].mxu1  ;;  %4594 = vmatprep.subr.bf16.mxu1 %v5247_v17 }
 0x5ce   : > { %v3463_v35 = vadd.f32 %v3462_v5, %v3054_v57 }
 0x5cf   : > { %v3467_v7 = vpack.c.bf16 %v3461_v37, %v3457_v25 }
 0x5d0   : > { %v3468_v8 = vpack.c.bf16 %v3463_v35, %v3459_v45 }
 0x5d1   : > { %v3471_v46 = vmul.bf16 %v3467_v7, %v3467_v7 }
 0x5d2   : > { %v3472_v38 = vmul.bf16 %v3468_v8, %v3468_v8 }
 0x5d3   : > { %v3475_v40 = vmul.bf16 %v3471_v46, %v3467_v7 }
 0x5d4   : > { %v3476_v11 = vmul.bf16 %v3472_v38, %v3468_v8 }
 0x5d5   : > { %v3479_v6 = vmul.bf16 1027030327, %v3475_v40 }
 0x5d6   : > { %v3480_v41 = vmul.bf16 1027030327, %v3476_v11 }
 0x5d7   : > { %v3483_v18 = vadd.bf16 %v3479_v6, %v3467_v7 }
 0x5d8   : > { %v3484_v10 = vadd.bf16 %v3480_v41, %v3468_v8 }
 0x5d9   : > { %v3487_v43 = vmul.bf16 1061961548, %v3483_v18 }
 0x5da   : > { %v3488_v13 = vmul.bf16 1061961548, %v3484_v10 }
 0x5db   : > { %5198 = vtanh.bf16 %v3487_v43 }
 0x5dc   : > { %5200 = vtanh.bf16 %v3488_v13 }
 0x5e6   : > { %v5199_v4 = vpop.eup %5198 }
 0x5e7   : > { %v5201_v14 = vpop.eup %5200  ;;  %v3495_v2 = vadd.bf16 1065369472, %v5199_v4 }
 0x5e8   : > { %v3496_v47 = vadd.bf16 1065369472, %v5201_v14 }
 0x5e9   : > { %v3499_v15 = vmul.bf16 1056980736, %v3495_v2 }
 0x5ea   : > { %v3500_v42 = vmul.bf16 1056980736, %v3496_v47 }
 0x5eb   : > { %v3503_v30 = vmul.bf16 %v3499_v15, %v3467_v7 }
 0x5ec   : > { %v3504_v49 = vmul.bf16 %v3500_v42, %v3468_v8 }
 0x5ee   : > { %3841 = vmatprep.mubr.bf16.mxu1 %v3504_v49 }
 0x5ef   : > { %3842 = vmatmul.mubr.bf16.vlgmr.msra.gmra.mrb[68].mxu1 %v3503_v30 }
 0x5f0   : > { %4610 = vmatprep.mubr.msk.bf16.mxu1 %vm5248_vm2, %v5247_v17  ;;  %4595 = vmatpush3.bf16.msra.mxu1 %v5128_v36 }
 0x5f1   : > { %4596 = vmatprep.subr.bf16.mxu1 %v5247_v17 }
 0x5f4   : > { %4597 = vmatpush3.bf16.msra.mxu1 %v5129_v19 }
 0x5f5   : > { %4598 = vmatprep.subr.bf16.mxu1 %v5247_v17 }
 0x5f8   : > { %4599 = vmatpush3.bf16.msra.mxu1 %v5130_v23 }
 0x5f9   : > { %4600 = vmatprep.subr.bf16.mxu1 %v5247_v17 }
 0x5fc   : > { %4601 = vmatpush3.bf16.msra.mxu1 %v5131_v39 }
 0x5fd   : > { %4602 = vmatprep.subr.bf16.mxu1 %v5247_v17 }
 0x600   : > { %4603 = vmatpush3.bf16.msra.mxu1 %v5132_v16 }
 0x601   : > { %4604 = vmatprep.subr.bf16.mxu1 %v5247_v17 }
 0x604   : > { %4605 = vmatpush3.bf16.msra.mxu1 %v5133_v60 }
 0x605   : > { %4606 = vmatprep.subr.bf16.mxu1 %v5247_v17 }
 0x608   : > { %4607 = vmatpush3.bf16.msra.mxu1 %v5134_v22 }
 0x609   : > { %4608 = vmatprep.subr.bf16.mxu1 %v5247_v17 }
 0x60c   : > { %4609 = vmatpush3.bf16.msra.mxu1 %v5135_v12 }
 0x682   : > { %v4459_v50 = vpop.f32.mrb[64].mxu1 }
 0x683   : > { %v4460_v24 = vpop.f32.mrb[65].mxu1 }
 0x684   : > { %v4461_v26 = vadd.f32 %v4460_v24, %v4459_v50  ;;  %v4462_v9 = vpop.f32.mrb[66].mxu1 }
 0x685   : > { %v4463_v28 = vpop.f32.mrb[67].mxu1 }
 0x686   : > { %v4464_v62 = vadd.f32 %v4463_v28, %v4462_v9  ;;  %v3803_v31 = vadd.f32 %v4461_v26, %v4363_v27 }
 0x688   : > { %v3806_v52 = vadd.f32 %v4464_v62, %v4363_v27 }
 0x6c2   : > { %v4481_v29 = vpop.f32.mrb[68].mxu1 }
 0x6c3   : > { %v4482_v55 = vpop.f32.mrb[69].mxu1 }
 0x6c4   : > { %v4483_v32 = vadd.f32 %v4482_v55, %v4481_v29  ;;  %v4484_v33 = vpop.f32.mrb[70].mxu1 }
 0x6c5   : > { %v4485_v21 = vpop.f32.mrb[71].mxu1 }
 0x6c6   : > { %v3844_v17 = vadd.f32 %v4483_v32, %v3803_v31  ;;  %v4486_v20 = vadd.f32 %v4485_v21, %v4484_v33 }
 0x6c8   : > { %v3847_v1 = vadd.f32 %v4486_v20, %v3806_v52 }
 0x6ca   : > { %v3850_v48 = vpack.c.bf16 %v3847_v1, %v3844_v17 }
 0x6cc   : > { %v3851_v3 = vmul.bf16 %v3850_v48, %v3850_v48 }
 0x6ce   : > { %v3852_v34 = vmul.bf16 %v3851_v3, %v3850_v48 }
 0x6d0   : > { %v3853_v51 = vmul.bf16 1027030327, %v3852_v34 }
 0x6d2   : > { %v3854_v53 = vadd.bf16 %v3853_v51, %v3850_v48 }
 0x6d4   : > { %v3855_v54 = vmul.bf16 1061961548, %v3854_v53 }
 0x6d6   : > { %5202 = vtanh.bf16 %v3855_v54 }
 0x6e1   : > { %v5203_v56 = vpop.eup %5202 }
 0x6e2   : > { %v3857_v58 = vadd.bf16 1065369472, %v5203_v56 }
 0x6e4   : > { %v3858_v59 = vmul.bf16 1056980736, %v3857_v58 }
 0x6e6   : > { %v3859_v61 = vmul.bf16 %v3858_v59, %v3850_v48 }
 0x6e8   : > { %4611 = vmatmul.mubr.bf16.vlgmr.msra.gmra.mrb[72].mxu1 %v3859_v61 }
 0x7bb   : > { %v3965_v57 = vpop.f32.mrb[72].mxu1 }
 0x7bc   : > { %v3966_v0 = vadd.f32 %v4396_v63, %v3965_v57  ;;  %v4612_v44 = vpop.f32.mrb[73].mxu1 }
 0x7bd   : > { %v3968_v25 = vpop.f32.mrb[74].mxu1 }
 0x7be   : > { %3972 = vst [vmem:[%s482_s20] sm:$0xff] %v3966_v0  ;;  %v3969_v37 = vadd.f32 %v4396_v63, %v3968_v25  ;;  %v4613_v5 = vpop.f32.mrb[75].mxu1 }
 0x7c0   : > { %3973 = vst [vmem:[%s482_s20 + $0x8] sm:$0xff] %v3969_v37 }
 0x7c1 PF: > { %s25_s29 = sadd.s32 1, %s5242_s29  }
 0x7c2   : > { %p22_p5 = scmp.ge.s32.totalorder %s25_s29, 4  }
 0x7c4   :  { %24 = sbr.rel (!%p22_p5) target bundleno = 1 (0x1), region = 116 }
 0x7cb   :  { %3996 = vsyncpa [#allocation3], 1 }
 0x7cc   :  { %3998 = vsyncpa [#allocation3 + $0x1], 1 }

</bundles_post_ra>
